<compile_context>
chip_gen: v5e
topology: v5e:2x2
jax: 0.10.0
libtpu: 0.0.40
codegen_flags: <defaults>
</compile_context>

<pallas_src>
import numpy as np
import jax
import jax.numpy as jnp
from jax.experimental import pallas as pl
from jax.experimental.pallas import tpu as pltpu

# ----------------------- module-consistent configuration -----------------------
BATCH         = 2
NUM_ENTITIES  = 16
NUM_RELATIONS = 8
ENTITY_DIM    = 32
RELATION_DIM  = 32
D1, D2        = 4, 8                    # emb_2D_d1 * emb_2D_d2 == entity_dim
C             = 4                       # num_out_channels
KD            = 3                       # kernel_size
H, W          = 2 * D1, D2              # stacked input spatial dims (8, 8)
HO            = 2 * D1 - KD + 1         # 6
WO            = D2 - KD + 1             # 6
FEAT_DIM      = C * HO * WO             # 144  (>= 128 lanes -> lane-dense)

BN_EPS    = 1e-5
BN0_SCALE = float(1.0 / np.sqrt(1.0 + BN_EPS))   # eval BN, running stats (0, 1)
BN2_SCALE = float(1.0 / np.sqrt(1.0 + BN_EPS))

# Padded / tiled sizes for the fused kernel.
M_PAD  = 8        # batch rows fed to the MXU (>= 8 sublanes; use 128+ for throughput)
TILE_E = 128      # entity tile (lane-dense output).  At real entity counts use
                  # 512-2048, but cap it so 2 buffers * TILE_E * ENTITY_DIM (+scratch)
                  # fits v7x's 64 MiB VMEM with headroom.
E_PAD  = ((NUM_ENTITIES + TILE_E - 1) // TILE_E) * TILE_E

# Static scatter pattern that lowers bn0 + conv2d(valid, 3x3, NCHW) + channel-major
# flatten into one (H*W, FEAT_DIM) matrix:  feat = x_flat @ W_conv  (x_flat is the
# row-major flattened stacked image, which is just concat(E1_row, R_row)).
_rows, _cols, _widx = [], [], []
for _c in range(C):
    for _i in range(HO):
        for _j in range(WO):
            for _ki in range(KD):
                for _kj in range(KD):
                    _rows.append((_i + _ki) * W + (_j + _kj))
                    _cols.append(_c * HO * WO + _i * WO + _j)
                    _widx.append(_c * KD * KD + _ki * KD + _kj)
_ROWS = np.asarray(_rows, np.int32)
_COLS = np.asarray(_cols, np.int32)
_WIDX = np.asarray(_widx, np.int32)


# ------------------------------- fused kernel ----------------------------------
def conve_fused_kernel(e1_ids, r_ids,              # scalar prefetch (SMEM, int32)
                       ent_hbm, rel_hbm,           # pl.ANY (HBM) embedding tables
                       wconv_ref, bconv_ref,       # lowered conv matrix / bias (f32)
                       fcw_ref, fcb_ref,           # fc weight (E_DIM, FEAT) bf16 / bias f32
                       e2_ref,                     # (TILE_E, ENTITY_DIM) bf16 entity tile
                       out_ref,                    # (M_PAD, TILE_E) f32 scores tile
                       e1_buf, r_buf, sem):        # scratch: gather buffers + DMA sems
    # ---- in-kernel embedding gather: one small DMA per row, all issued then waited.
    copies = []
    for b in range(M_PAD):
        ce = pltpu.make_async_copy(ent_hbm.at[pl.ds(e1_ids[b], 1), :],
                                   e1_buf.at[pl.ds(b, 1), :], sem.at[0, b])
        cr = pltpu.make_async_copy(rel_hbm.at[pl.ds(r_ids[b], 1), :],
                                   r_buf.at[pl.ds(b, 1), :], sem.at[1, b])
        ce.start()
        cr.start()
        copies.append(ce)
        copies.append(cr)
    for cp in copies:
        cp.wait()

    # ---- stacked input: cat([E1.view(d1,d2), R.view(d1,d2)], dim=H), flattened
    #      row-major, is exactly the lane-concat of the two embedding rows.
    x = jnp.concatenate([e1_buf[...], r_buf[...]], axis=-1)          # (M_PAD, H*W) f32

    # ---- bn0 + conv + bias + relu: bn0 scale is folded into wconv; the matmul
    #      output is already the channel-major NCHW flatten (lane-dense, 144).
    feat = jnp.dot(x, wconv_ref[...], preferred_element_type=jnp.float32)
    feat = jnp.maximum(feat + bconv_ref[...], 0.0)                   # (M_PAD, FEAT_DIM)

    # ---- fc + bn2 + relu (bn2 eval scale pre-folded into fcw/fcb; fc weight is
    #      kept untransposed -> contract its dim 1).  bf16 MXU, f32 accumulation.
    h = jax.lax.dot_general(feat.astype(jnp.bfloat16), fcw_ref[...],
                            (((1,), (1,)), ((), ())),
                            preferred_element_type=jnp.float32)      # (M_PAD, ENTITY_DIM)
    h = jnp.maximum(h + fcb_ref[...], 0.0)

    # ---- scores for this entity tile: sigmoid(h @ E2_tile.T), E2 untransposed.
    s = jax.lax.dot_general(h.astype(jnp.bfloat16), e2_ref[...],
                            (((1,), (1,)), ((), ())),
                            preferred_element_type=jnp.float32)      # (M_PAD, TILE_E)
    # exp goes to the EUP; reciprocal keeps the divide off the VALU path.
    # (flip to approx=True for a bit more EUP headroom if tolerance allows)
    out_ref[...] = pl.reciprocal(1.0 + jnp.exp(-s), approx=False)


# --------------------------------- wrapper --------------------------------------
@jax.jit
def kge_forward(e1_idx, r_idx, ent_emb, rel_emb, conv_w, conv_b, fc_w, fc_b):
    B = e1_idx.shape[0]
    assert B <= M_PAD
    E = ent_emb.shape[0]

    # --- tiny trace-time parameter preprocessing (would be precomputed once) ---
    # bn0(eval) + conv2d + channel-major flatten lowered to one (H*W, FEAT_DIM) matrix.
    w_vals = conv_w.reshape(-1)[_WIDX] * BN0_SCALE
    w_conv = jnp.zeros((H * W, FEAT_DIM), jnp.float32).at[_ROWS, _COLS].set(w_vals)
    b_conv = jnp.repeat(conv_b, HO * WO).reshape(1, FEAT_DIM)
    # bn2(eval) folded into the fc layer; matmul weights stored as bf16.
    fc_w_bf = (fc_w * BN2_SCALE).astype(jnp.bfloat16)                 # (ENTITY_DIM, FEAT_DIM)
    fc_b_f  = (fc_b * BN2_SCALE).reshape(1, ENTITY_DIM)
    # entity table padded to a multiple of TILE_E; bf16 copy for the scores stream.
    ent_pad_bf = jnp.pad(ent_emb, ((0, E_PAD - E), (0, 0))).astype(jnp.bfloat16)

    e1_p = jnp.pad(e1_idx.astype(jnp.int32), (0, M_PAD - B))
    r_p  = jnp.pad(r_idx.astype(jnp.int32), (0, M_PAD - B))

    grid_spec = pltpu.PrefetchScalarGridSpec(
        num_scalar_prefetch=2,
        grid=(E_PAD // TILE_E,),
        in_specs=[
            pl.BlockSpec(memory_space=pl.ANY),                             # ent table (gather src, f32)
            pl.BlockSpec(memory_space=pl.ANY),                             # rel table (gather src, f32)
            pl.BlockSpec((H * W, FEAT_DIM), lambda j, e1, r: (0, 0)),      # lowered conv matrix
            pl.BlockSpec((1, FEAT_DIM), lambda j, e1, r: (0, 0)),          # conv bias
            pl.BlockSpec((ENTITY_DIM, FEAT_DIM), lambda j, e1, r: (0, 0)), # fc weight (bf16)
            pl.BlockSpec((1, ENTITY_DIM), lambda j, e1, r: (0, 0)),        # fc bias
            pl.BlockSpec((TILE_E, ENTITY_DIM), lambda j, e1, r: (j, 0)),   # E2 tile (bf16)
        ],
        out_specs=pl.BlockSpec((M_PAD, TILE_E), lambda j, e1, r: (0, j)),
        scratch_shapes=[
            pltpu.VMEM((M_PAD, ENTITY_DIM), jnp.float32),    # gathered E1 rows
            pltpu.VMEM((M_PAD, RELATION_DIM), jnp.float32),  # gathered R rows
            pltpu.SemaphoreType.DMA((2, M_PAD)),
        ],
    )

    scores_pad = pl.pallas_call(
        conve_fused_kernel,
        out_shape=jax.ShapeDtypeStruct((M_PAD, E_PAD), jnp.float32),
        grid_spec=grid_spec,
        compiler_params=pltpu.CompilerParams(
            dimension_semantics=("parallel",)),
    )(e1_p, r_p, ent_emb, rel_emb, w_conv, b_conv, fc_w_bf, fc_b_f, ent_pad_bf)

    return scores_pad[:B, :E]


# ----------------------------- pure-JAX reference -------------------------------
def reference(e1_idx, r_idx, ent_emb, rel_emb, conv_w, conv_b, fc_w, fc_b):
    E1 = jnp.take(ent_emb, e1_idx, axis=0).reshape(-1, 1, D1, D2)
    R  = jnp.take(rel_emb, r_idx, axis=0).reshape(-1, 1, D1, D2)
    x  = jnp.concatenate([E1, R], axis=2) * BN0_SCALE
    y  = jax.lax.conv_general_dilated(
        x, conv_w, window_strides=(1, 1), padding='VALID',
        dimension_numbers=('NCHW', 'OIHW', 'NCHW'))
    y  = jnp.maximum(y + conv_b.reshape(1, C, 1, 1), 0.0)
    y  = y.reshape(y.shape[0], -1)
    h  = jnp.maximum((y @ fc_w.T + fc_b) * BN2_SCALE, 0.0)
    return jax.nn.sigmoid(h @ ent_emb.T)


# ------------------------------------ main ---------------------------------------
if __name__ == "__main__":
    key = jax.random.PRNGKey(0)
    k_ent, k_rel, k_cw, k_cb, k_fw, k_fb, k_e1, k_r = jax.random.split(key, 8)

    # xavier_normal_ for the embedding tables
    ent_std = np.sqrt(2.0 / (NUM_ENTITIES + ENTITY_DIM))
    rel_std = np.sqrt(2.0 / (NUM_RELATIONS + RELATION_DIM))
    ent_emb = jax.random.normal(k_ent, (NUM_ENTITIES, ENTITY_DIM), jnp.float32) * ent_std
    rel_emb = jax.random.normal(k_rel, (NUM_RELATIONS, RELATION_DIM), jnp.float32) * rel_std

    # synthetic conv / fc parameters (shapes per ConvE.__init__)
    conv_w = jax.random.normal(k_cw, (C, 1, KD, KD), jnp.float32) * 0.1
    conv_b = jax.random.normal(k_cb, (C,), jnp.float32) * 0.1
    fc_w   = jax.random.normal(k_fw, (ENTITY_DIM, FEAT_DIM), jnp.float32) * 0.05
    fc_b   = jax.random.normal(k_fb, (ENTITY_DIM,), jnp.float32) * 0.05

    # mini-batch of (e1, r) indices (format_batch output; e2 unused by predict path)
    e1_idx = jax.random.randint(k_e1, (BATCH,), 0, NUM_ENTITIES, dtype=jnp.int32)
    r_idx  = jax.random.randint(k_r, (BATCH,), 0, NUM_RELATIONS, dtype=jnp.int32)

    scores = kge_forward(e1_idx, r_idx, ent_emb, rel_emb, conv_w, conv_b, fc_w, fc_b)
    scores = jax.block_until_ready(scores)

    ref = reference(e1_idx, r_idx, ent_emb, rel_emb, conv_w, conv_b, fc_w, fc_b)
    np.testing.assert_allclose(np.asarray(scores), np.asarray(ref), rtol=2e-3, atol=2e-3)

    print("KERNEL_OK")
</pallas_src>

<mosaic_0001>
module attributes {stable_mosaic.version = 11 : i64} {
  func.func @conve_fused_kernel(%arg0: i32, %arg1: memref<8xi32, #tpu.memory_space<smem>>, %arg2: memref<8xi32, #tpu.memory_space<smem>>, %arg3: memref<16x32xf32, #tpu.memory_space<any>>, %arg4: memref<8x32xf32, #tpu.memory_space<any>>, %arg5: memref<64x144xf32, #tpu.memory_space<vmem>>, %arg6: memref<1x144xf32, #tpu.memory_space<vmem>>, %arg7: memref<32x144xbf16, #tpu.memory_space<vmem>>, %arg8: memref<1x32xf32, #tpu.memory_space<vmem>>, %arg9: memref<128x32xbf16, #tpu.memory_space<vmem>>, %arg10: memref<8x128xf32, #tpu.memory_space<vmem>>, %arg11: memref<8x32xf32, #tpu.memory_space<vmem>>, %arg12: memref<8x32xf32, #tpu.memory_space<vmem>>, %arg13: memref<2x8x!tpu.dma_semaphore, #tpu.memory_space<semaphore_mem>>) attributes {dimension_semantics = [#tpu.dimension_semantics<parallel>], iteration_bounds = array<i64: 1>, scalar_prefetch = 2 : i64, scratch_operands = 3 : i64, tpu.core_type = #tpu.core_type<tc>, window_params = [{}, {}, {pipeline_mode = #tpu.pipeline_mode<synchronous>, transform_indices = @transform_2, window_bounds = array<i64: 64, 144>}, {pipeline_mode = #tpu.pipeline_mode<synchronous>, transform_indices = @transform_3, window_bounds = array<i64: 1, 144>}, {pipeline_mode = #tpu.pipeline_mode<synchronous>, transform_indices = @transform_4, window_bounds = array<i64: 32, 144>}, {pipeline_mode = #tpu.pipeline_mode<synchronous>, transform_indices = @transform_5, window_bounds = array<i64: 1, 32>}, {transform_indices = @transform_6, window_bounds = array<i64: 128, 32>}, {transform_indices = @transform_7, window_bounds = array<i64: 8, 128>}]} {
    %c0 = arith.constant 0 : index
    %0 = memref.load %arg1[%c0] : memref<8xi32, #tpu.memory_space<smem>>
    %c0_0 = arith.constant 0 : index
    %1 = memref.load %arg2[%c0_0] : memref<8xi32, #tpu.memory_space<smem>>
    %c0_i32 = arith.constant 0 : i32
    %c0_i32_1 = arith.constant 0 : i32
    %c0_i32_2 = arith.constant 0 : i32
    %2 = tpu.memref_slice %arg3[%0, %c0_i32_2] : memref<16x32xf32, #tpu.memory_space<any>> -> memref<1x32xf32, #tpu.memory_space<any>>
    %c0_i32_3 = arith.constant 0 : i32
    %c0_i32_4 = arith.constant 0 : i32
    %3 = tpu.memref_slice %arg11[%c0_i32_3, %c0_i32_4] : memref<8x32xf32, #tpu.memory_space<vmem>> -> memref<1x32xf32, #tpu.memory_space<vmem>>
    %4 = tpu.memref_slice %arg13[%c0_i32, %c0_i32_1] : memref<2x8x!tpu.dma_semaphore, #tpu.memory_space<semaphore_mem>> -> memref<1x1x!tpu.dma_semaphore, #tpu.memory_space<semaphore_mem>>
    %5 = tpu.memref_squeeze %4 : memref<1x1x!tpu.dma_semaphore, #tpu.memory_space<semaphore_mem>> -> memref<!tpu.dma_semaphore, #tpu.memory_space<semaphore_mem>>
    tpu.enqueue_dma source(%2 : memref<1x32xf32, #tpu.memory_space<any>>) target(%3 : memref<1x32xf32, #tpu.memory_space<vmem>>) target_semaphore(%5 : memref<!tpu.dma_semaphore, #tpu.memory_space<semaphore_mem>>)
    %c1_i32 = arith.constant 1 : i32
    %c0_i32_5 = arith.constant 0 : i32
    %c0_i32_6 = arith.constant 0 : i32
    %6 = tpu.memref_slice %arg4[%1, %c0_i32_6] : memref<8x32xf32, #tpu.memory_space<any>> -> memref<1x32xf32, #tpu.memory_space<any>>
    %c0_i32_7 = arith.constant 0 : i32
    %c0_i32_8 = arith.constant 0 : i32
    %7 = tpu.memref_slice %arg12[%c0_i32_7, %c0_i32_8] : memref<8x32xf32, #tpu.memory_space<vmem>> -> memref<1x32xf32, #tpu.memory_space<vmem>>
    %8 = tpu.memref_slice %arg13[%c1_i32, %c0_i32_5] : memref<2x8x!tpu.dma_semaphore, #tpu.memory_space<semaphore_mem>> -> memref<1x1x!tpu.dma_semaphore, #tpu.memory_space<semaphore_mem>>
    %9 = tpu.memref_squeeze %8 : memref<1x1x!tpu.dma_semaphore, #tpu.memory_space<semaphore_mem>> -> memref<!tpu.dma_semaphore, #tpu.memory_space<semaphore_mem>>
    tpu.enqueue_dma source(%6 : memref<1x32xf32, #tpu.memory_space<any>>) target(%7 : memref<1x32xf32, #tpu.memory_space<vmem>>) target_semaphore(%9 : memref<!tpu.dma_semaphore, #tpu.memory_space<semaphore_mem>>)
    %c1 = arith.constant 1 : index
    %10 = memref.load %arg1[%c1] : memref<8xi32, #tpu.memory_space<smem>>
    %c1_9 = arith.constant 1 : index
    %11 = memref.load %arg2[%c1_9] : memref<8xi32, #tpu.memory_space<smem>>
    %c0_i32_10 = arith.constant 0 : i32
    %c1_i32_11 = arith.constant 1 : i32
    %c0_i32_12 = arith.constant 0 : i32
    %12 = tpu.memref_slice %arg3[%10, %c0_i32_12] : memref<16x32xf32, #tpu.memory_space<any>> -> memref<1x32xf32, #tpu.memory_space<any>>
    %c1_i32_13 = arith.constant 1 : i32
    %c0_i32_14 = arith.constant 0 : i32
    %13 = tpu.memref_slice %arg11[%c1_i32_13, %c0_i32_14] : memref<8x32xf32, #tpu.memory_space<vmem>> -> memref<1x32xf32, #tpu.memory_space<vmem>>
    %14 = tpu.memref_slice %arg13[%c0_i32_10, %c1_i32_11] : memref<2x8x!tpu.dma_semaphore, #tpu.memory_space<semaphore_mem>> -> memref<1x1x!tpu.dma_semaphore, #tpu.memory_space<semaphore_mem>>
    %15 = tpu.memref_squeeze %14 : memref<1x1x!tpu.dma_semaphore, #tpu.memory_space<semaphore_mem>> -> memref<!tpu.dma_semaphore, #tpu.memory_space<semaphore_mem>>
    tpu.enqueue_dma source(%12 : memref<1x32xf32, #tpu.memory_space<any>>) target(%13 : memref<1x32xf32, #tpu.memory_space<vmem>>) target_semaphore(%15 : memref<!tpu.dma_semaphore, #tpu.memory_space<semaphore_mem>>)
    %c1_i32_15 = arith.constant 1 : i32
    %c1_i32_16 = arith.constant 1 : i32
    %c0_i32_17 = arith.constant 0 : i32
    %16 = tpu.memref_slice %arg4[%11, %c0_i32_17] : memref<8x32xf32, #tpu.memory_space<any>> -> memref<1x32xf32, #tpu.memory_space<any>>
    %c1_i32_18 = arith.constant 1 : i32
    %c0_i32_19 = arith.constant 0 : i32
    %17 = tpu.memref_slice %arg12[%c1_i32_18, %c0_i32_19] : memref<8x32xf32, #tpu.memory_space<vmem>> -> memref<1x32xf32, #tpu.memory_space<vmem>>
    %18 = tpu.memref_slice %arg13[%c1_i32_15, %c1_i32_16] : memref<2x8x!tpu.dma_semaphore, #tpu.memory_space<semaphore_mem>> -> memref<1x1x!tpu.dma_semaphore, #tpu.memory_space<semaphore_mem>>
    %19 = tpu.memref_squeeze %18 : memref<1x1x!tpu.dma_semaphore, #tpu.memory_space<semaphore_mem>> -> memref<!tpu.dma_semaphore, #tpu.memory_space<semaphore_mem>>
    tpu.enqueue_dma source(%16 : memref<1x32xf32, #tpu.memory_space<any>>) target(%17 : memref<1x32xf32, #tpu.memory_space<vmem>>) target_semaphore(%19 : memref<!tpu.dma_semaphore, #tpu.memory_space<semaphore_mem>>)
    %c2 = arith.constant 2 : index
    %20 = memref.load %arg1[%c2] : memref<8xi32, #tpu.memory_space<smem>>
    %c2_20 = arith.constant 2 : index
    %21 = memref.load %arg2[%c2_20] : memref<8xi32, #tpu.memory_space<smem>>
    %c0_i32_21 = arith.constant 0 : i32
    %c2_i32 = arith.constant 2 : i32
    %c0_i32_22 = arith.constant 0 : i32
    %22 = tpu.memref_slice %arg3[%20, %c0_i32_22] : memref<16x32xf32, #tpu.memory_space<any>> -> memref<1x32xf32, #tpu.memory_space<any>>
    %c2_i32_23 = arith.constant 2 : i32
    %c0_i32_24 = arith.constant 0 : i32
    %23 = tpu.memref_slice %arg11[%c2_i32_23, %c0_i32_24] : memref<8x32xf32, #tpu.memory_space<vmem>> -> memref<1x32xf32, #tpu.memory_space<vmem>>
    %24 = tpu.memref_slice %arg13[%c0_i32_21, %c2_i32] : memref<2x8x!tpu.dma_semaphore, #tpu.memory_space<semaphore_mem>> -> memref<1x1x!tpu.dma_semaphore, #tpu.memory_space<semaphore_mem>>
    %25 = tpu.memref_squeeze %24 : memref<1x1x!tpu.dma_semaphore, #tpu.memory_space<semaphore_mem>> -> memref<!tpu.dma_semaphore, #tpu.memory_space<semaphore_mem>>
    tpu.enqueue_dma source(%22 : memref<1x32xf32, #tpu.memory_space<any>>) target(%23 : memref<1x32xf32, #tpu.memory_space<vmem>>) target_semaphore(%25 : memref<!tpu.dma_semaphore, #tpu.memory_space<semaphore_mem>>)
    %c1_i32_25 = arith.constant 1 : i32
    %c2_i32_26 = arith.constant 2 : i32
    %c0_i32_27 = arith.constant 0 : i32
    %26 = tpu.memref_slice %arg4[%21, %c0_i32_27] : memref<8x32xf32, #tpu.memory_space<any>> -> memref<1x32xf32, #tpu.memory_space<any>>
    %c2_i32_28 = arith.constant 2 : i32
    %c0_i32_29 = arith.constant 0 : i32
    %27 = tpu.memref_slice %arg12[%c2_i32_28, %c0_i32_29] : memref<8x32xf32, #tpu.memory_space<vmem>> -> memref<1x32xf32, #tpu.memory_space<vmem>>
    %28 = tpu.memref_slice %arg13[%c1_i32_25, %c2_i32_26] : memref<2x8x!tpu.dma_semaphore, #tpu.memory_space<semaphore_mem>> -> memref<1x1x!tpu.dma_semaphore, #tpu.memory_space<semaphore_mem>>
    %29 = tpu.memref_squeeze %28 : memref<1x1x!tpu.dma_semaphore, #tpu.memory_space<semaphore_mem>> -> memref<!tpu.dma_semaphore, #tpu.memory_space<semaphore_mem>>
    tpu.enqueue_dma source(%26 : memref<1x32xf32, #tpu.memory_space<any>>) target(%27 : memref<1x32xf32, #tpu.memory_space<vmem>>) target_semaphore(%29 : memref<!tpu.dma_semaphore, #tpu.memory_space<semaphore_mem>>)
    %c3 = arith.constant 3 : index
    %30 = memref.load %arg1[%c3] : memref<8xi32, #tpu.memory_space<smem>>
    %c3_30 = arith.constant 3 : index
    %31 = memref.load %arg2[%c3_30] : memref<8xi32, #tpu.memory_space<smem>>
    %c0_i32_31 = arith.constant 0 : i32
    %c3_i32 = arith.constant 3 : i32
    %c0_i32_32 = arith.constant 0 : i32
    %32 = tpu.memref_slice %arg3[%30, %c0_i32_32] : memref<16x32xf32, #tpu.memory_space<any>> -> memref<1x32xf32, #tpu.memory_space<any>>
    %c3_i32_33 = arith.constant 3 : i32
    %c0_i32_34 = arith.constant 0 : i32
    %33 = tpu.memref_slice %arg11[%c3_i32_33, %c0_i32_34] : memref<8x32xf32, #tpu.memory_space<vmem>> -> memref<1x32xf32, #tpu.memory_space<vmem>>
    %34 = tpu.memref_slice %arg13[%c0_i32_31, %c3_i32] : memref<2x8x!tpu.dma_semaphore, #tpu.memory_space<semaphore_mem>> -> memref<1x1x!tpu.dma_semaphore, #tpu.memory_space<semaphore_mem>>
    %35 = tpu.memref_squeeze %34 : memref<1x1x!tpu.dma_semaphore, #tpu.memory_space<semaphore_mem>> -> memref<!tpu.dma_semaphore, #tpu.memory_space<semaphore_mem>>
    tpu.enqueue_dma source(%32 : memref<1x32xf32, #tpu.memory_space<any>>) target(%33 : memref<1x32xf32, #tpu.memory_space<vmem>>) target_semaphore(%35 : memref<!tpu.dma_semaphore, #tpu.memory_space<semaphore_mem>>)
    %c1_i32_35 = arith.constant 1 : i32
    %c3_i32_36 = arith.constant 3 : i32
    %c0_i32_37 = arith.constant 0 : i32
    %36 = tpu.memref_slice %arg4[%31, %c0_i32_37] : memref<8x32xf32, #tpu.memory_space<any>> -> memref<1x32xf32, #tpu.memory_space<any>>
    %c3_i32_38 = arith.constant 3 : i32
    %c0_i32_39 = arith.constant 0 : i32
    %37 = tpu.memref_slice %arg12[%c3_i32_38, %c0_i32_39] : memref<8x32xf32, #tpu.memory_space<vmem>> -> memref<1x32xf32, #tpu.memory_space<vmem>>
    %38 = tpu.memref_slice %arg13[%c1_i32_35, %c3_i32_36] : memref<2x8x!tpu.dma_semaphore, #tpu.memory_space<semaphore_mem>> -> memref<1x1x!tpu.dma_semaphore, #tpu.memory_space<semaphore_mem>>
    %39 = tpu.memref_squeeze %38 : memref<1x1x!tpu.dma_semaphore, #tpu.memory_space<semaphore_mem>> -> memref<!tpu.dma_semaphore, #tpu.memory_space<semaphore_mem>>
    tpu.enqueue_dma source(%36 : memref<1x32xf32, #tpu.memory_space<any>>) target(%37 : memref<1x32xf32, #tpu.memory_space<vmem>>) target_semaphore(%39 : memref<!tpu.dma_semaphore, #tpu.memory_space<semaphore_mem>>)
    %c4 = arith.constant 4 : index
    %40 = memref.load %arg1[%c4] : memref<8xi32, #tpu.memory_space<smem>>
    %c4_40 = arith.constant 4 : index
    %41 = memref.load %arg2[%c4_40] : memref<8xi32, #tpu.memory_space<smem>>
    %c0_i32_41 = arith.constant 0 : i32
    %c4_i32 = arith.constant 4 : i32
    %c0_i32_42 = arith.constant 0 : i32
    %42 = tpu.memref_slice %arg3[%40, %c0_i32_42] : memref<16x32xf32, #tpu.memory_space<any>> -> memref<1x32xf32, #tpu.memory_space<any>>
    %c4_i32_43 = arith.constant 4 : i32
    %c0_i32_44 = arith.constant 0 : i32
    %43 = tpu.memref_slice %arg11[%c4_i32_43, %c0_i32_44] : memref<8x32xf32, #tpu.memory_space<vmem>> -> memref<1x32xf32, #tpu.memory_space<vmem>>
    %44 = tpu.memref_slice %arg13[%c0_i32_41, %c4_i32] : memref<2x8x!tpu.dma_semaphore, #tpu.memory_space<semaphore_mem>> -> memref<1x1x!tpu.dma_semaphore, #tpu.memory_space<semaphore_mem>>
    %45 = tpu.memref_squeeze %44 : memref<1x1x!tpu.dma_semaphore, #tpu.memory_space<semaphore_mem>> -> memref<!tpu.dma_semaphore, #tpu.memory_space<semaphore_mem>>
    tpu.enqueue_dma source(%42 : memref<1x32xf32, #tpu.memory_space<any>>) target(%43 : memref<1x32xf32, #tpu.memory_space<vmem>>) target_semaphore(%45 : memref<!tpu.dma_semaphore, #tpu.memory_space<semaphore_mem>>)
    %c1_i32_45 = arith.constant 1 : i32
    %c4_i32_46 = arith.constant 4 : i32
    %c0_i32_47 = arith.constant 0 : i32
    %46 = tpu.memref_slice %arg4[%41, %c0_i32_47] : memref<8x32xf32, #tpu.memory_space<any>> -> memref<1x32xf32, #tpu.memory_space<any>>
    %c4_i32_48 = arith.constant 4 : i32
    %c0_i32_49 = arith.constant 0 : i32
    %47 = tpu.memref_slice %arg12[%c4_i32_48, %c0_i32_49] : memref<8x32xf32, #tpu.memory_space<vmem>> -> memref<1x32xf32, #tpu.memory_space<vmem>>
    %48 = tpu.memref_slice %arg13[%c1_i32_45, %c4_i32_46] : memref<2x8x!tpu.dma_semaphore, #tpu.memory_space<semaphore_mem>> -> memref<1x1x!tpu.dma_semaphore, #tpu.memory_space<semaphore_mem>>
    %49 = tpu.memref_squeeze %48 : memref<1x1x!tpu.dma_semaphore, #tpu.memory_space<semaphore_mem>> -> memref<!tpu.dma_semaphore, #tpu.memory_space<semaphore_mem>>
    tpu.enqueue_dma source(%46 : memref<1x32xf32, #tpu.memory_space<any>>) target(%47 : memref<1x32xf32, #tpu.memory_space<vmem>>) target_semaphore(%49 : memref<!tpu.dma_semaphore, #tpu.memory_space<semaphore_mem>>)
    %c5 = arith.constant 5 : index
    %50 = memref.load %arg1[%c5] : memref<8xi32, #tpu.memory_space<smem>>
    %c5_50 = arith.constant 5 : index
    %51 = memref.load %arg2[%c5_50] : memref<8xi32, #tpu.memory_space<smem>>
    %c0_i32_51 = arith.constant 0 : i32
    %c5_i32 = arith.constant 5 : i32
    %c0_i32_52 = arith.constant 0 : i32
    %52 = tpu.memref_slice %arg3[%50, %c0_i32_52] : memref<16x32xf32, #tpu.memory_space<any>> -> memref<1x32xf32, #tpu.memory_space<any>>
    %c5_i32_53 = arith.constant 5 : i32
    %c0_i32_54 = arith.constant 0 : i32
    %53 = tpu.memref_slice %arg11[%c5_i32_53, %c0_i32_54] : memref<8x32xf32, #tpu.memory_space<vmem>> -> memref<1x32xf32, #tpu.memory_space<vmem>>
    %54 = tpu.memref_slice %arg13[%c0_i32_51, %c5_i32] : memref<2x8x!tpu.dma_semaphore, #tpu.memory_space<semaphore_mem>> -> memref<1x1x!tpu.dma_semaphore, #tpu.memory_space<semaphore_mem>>
    %55 = tpu.memref_squeeze %54 : memref<1x1x!tpu.dma_semaphore, #tpu.memory_space<semaphore_mem>> -> memref<!tpu.dma_semaphore, #tpu.memory_space<semaphore_mem>>
    tpu.enqueue_dma source(%52 : memref<1x32xf32, #tpu.memory_space<any>>) target(%53 : memref<1x32xf32, #tpu.memory_space<vmem>>) target_semaphore(%55 : memref<!tpu.dma_semaphore, #tpu.memory_space<semaphore_mem>>)
    %c1_i32_55 = arith.constant 1 : i32
    %c5_i32_56 = arith.constant 5 : i32
    %c0_i32_57 = arith.constant 0 : i32
    %56 = tpu.memref_slice %arg4[%51, %c0_i32_57] : memref<8x32xf32, #tpu.memory_space<any>> -> memref<1x32xf32, #tpu.memory_space<any>>
    %c5_i32_58 = arith.constant 5 : i32
    %c0_i32_59 = arith.constant 0 : i32
    %57 = tpu.memref_slice %arg12[%c5_i32_58, %c0_i32_59] : memref<8x32xf32, #tpu.memory_space<vmem>> -> memref<1x32xf32, #tpu.memory_space<vmem>>
    %58 = tpu.memref_slice %arg13[%c1_i32_55, %c5_i32_56] : memref<2x8x!tpu.dma_semaphore, #tpu.memory_space<semaphore_mem>> -> memref<1x1x!tpu.dma_semaphore, #tpu.memory_space<semaphore_mem>>
    %59 = tpu.memref_squeeze %58 : memref<1x1x!tpu.dma_semaphore, #tpu.memory_space<semaphore_mem>> -> memref<!tpu.dma_semaphore, #tpu.memory_space<semaphore_mem>>
    tpu.enqueue_dma source(%56 : memref<1x32xf32, #tpu.memory_space<any>>) target(%57 : memref<1x32xf32, #tpu.memory_space<vmem>>) target_semaphore(%59 : memref<!tpu.dma_semaphore, #tpu.memory_space<semaphore_mem>>)
    %c6 = arith.constant 6 : index
    %60 = memref.load %arg1[%c6] : memref<8xi32, #tpu.memory_space<smem>>
    %c6_60 = arith.constant 6 : index
    %61 = memref.load %arg2[%c6_60] : memref<8xi32, #tpu.memory_space<smem>>
    %c0_i32_61 = arith.constant 0 : i32
    %c6_i32 = arith.constant 6 : i32
    %c0_i32_62 = arith.constant 0 : i32
    %62 = tpu.memref_slice %arg3[%60, %c0_i32_62] : memref<16x32xf32, #tpu.memory_space<any>> -> memref<1x32xf32, #tpu.memory_space<any>>
    %c6_i32_63 = arith.constant 6 : i32
    %c0_i32_64 = arith.constant 0 : i32
    %63 = tpu.memref_slice %arg11[%c6_i32_63, %c0_i32_64] : memref<8x32xf32, #tpu.memory_space<vmem>> -> memref<1x32xf32, #tpu.memory_space<vmem>>
    %64 = tpu.memref_slice %arg13[%c0_i32_61, %c6_i32] : memref<2x8x!tpu.dma_semaphore, #tpu.memory_space<semaphore_mem>> -> memref<1x1x!tpu.dma_semaphore, #tpu.memory_space<semaphore_mem>>
    %65 = tpu.memref_squeeze %64 : memref<1x1x!tpu.dma_semaphore, #tpu.memory_space<semaphore_mem>> -> memref<!tpu.dma_semaphore, #tpu.memory_space<semaphore_mem>>
    tpu.enqueue_dma source(%62 : memref<1x32xf32, #tpu.memory_space<any>>) target(%63 : memref<1x32xf32, #tpu.memory_space<vmem>>) target_semaphore(%65 : memref<!tpu.dma_semaphore, #tpu.memory_space<semaphore_mem>>)
    %c1_i32_65 = arith.constant 1 : i32
    %c6_i32_66 = arith.constant 6 : i32
    %c0_i32_67 = arith.constant 0 : i32
    %66 = tpu.memref_slice %arg4[%61, %c0_i32_67] : memref<8x32xf32, #tpu.memory_space<any>> -> memref<1x32xf32, #tpu.memory_space<any>>
    %c6_i32_68 = arith.constant 6 : i32
    %c0_i32_69 = arith.constant 0 : i32
    %67 = tpu.memref_slice %arg12[%c6_i32_68, %c0_i32_69] : memref<8x32xf32, #tpu.memory_space<vmem>> -> memref<1x32xf32, #tpu.memory_space<vmem>>
    %68 = tpu.memref_slice %arg13[%c1_i32_65, %c6_i32_66] : memref<2x8x!tpu.dma_semaphore, #tpu.memory_space<semaphore_mem>> -> memref<1x1x!tpu.dma_semaphore, #tpu.memory_space<semaphore_mem>>
    %69 = tpu.memref_squeeze %68 : memref<1x1x!tpu.dma_semaphore, #tpu.memory_space<semaphore_mem>> -> memref<!tpu.dma_semaphore, #tpu.memory_space<semaphore_mem>>
    tpu.enqueue_dma source(%66 : memref<1x32xf32, #tpu.memory_space<any>>) target(%67 : memref<1x32xf32, #tpu.memory_space<vmem>>) target_semaphore(%69 : memref<!tpu.dma_semaphore, #tpu.memory_space<semaphore_mem>>)
    %c7 = arith.constant 7 : index
    %70 = memref.load %arg1[%c7] : memref<8xi32, #tpu.memory_space<smem>>
    %c7_70 = arith.constant 7 : index
    %71 = memref.load %arg2[%c7_70] : memref<8xi32, #tpu.memory_space<smem>>
    %c0_i32_71 = arith.constant 0 : i32
    %c7_i32 = arith.constant 7 : i32
    %c0_i32_72 = arith.constant 0 : i32
    %72 = tpu.memref_slice %arg3[%70, %c0_i32_72] : memref<16x32xf32, #tpu.memory_space<any>> -> memref<1x32xf32, #tpu.memory_space<any>>
    %c7_i32_73 = arith.constant 7 : i32
    %c0_i32_74 = arith.constant 0 : i32
    %73 = tpu.memref_slice %arg11[%c7_i32_73, %c0_i32_74] : memref<8x32xf32, #tpu.memory_space<vmem>> -> memref<1x32xf32, #tpu.memory_space<vmem>>
    %74 = tpu.memref_slice %arg13[%c0_i32_71, %c7_i32] : memref<2x8x!tpu.dma_semaphore, #tpu.memory_space<semaphore_mem>> -> memref<1x1x!tpu.dma_semaphore, #tpu.memory_space<semaphore_mem>>
    %75 = tpu.memref_squeeze %74 : memref<1x1x!tpu.dma_semaphore, #tpu.memory_space<semaphore_mem>> -> memref<!tpu.dma_semaphore, #tpu.memory_space<semaphore_mem>>
    tpu.enqueue_dma source(%72 : memref<1x32xf32, #tpu.memory_space<any>>) target(%73 : memref<1x32xf32, #tpu.memory_space<vmem>>) target_semaphore(%75 : memref<!tpu.dma_semaphore, #tpu.memory_space<semaphore_mem>>)
    %c1_i32_75 = arith.constant 1 : i32
    %c7_i32_76 = arith.constant 7 : i32
    %c0_i32_77 = arith.constant 0 : i32
    %76 = tpu.memref_slice %arg4[%71, %c0_i32_77] : memref<8x32xf32, #tpu.memory_space<any>> -> memref<1x32xf32, #tpu.memory_space<any>>
    %c7_i32_78 = arith.constant 7 : i32
    %c0_i32_79 = arith.constant 0 : i32
    %77 = tpu.memref_slice %arg12[%c7_i32_78, %c0_i32_79] : memref<8x32xf32, #tpu.memory_space<vmem>> -> memref<1x32xf32, #tpu.memory_space<vmem>>
    %78 = tpu.memref_slice %arg13[%c1_i32_75, %c7_i32_76] : memref<2x8x!tpu.dma_semaphore, #tpu.memory_space<semaphore_mem>> -> memref<1x1x!tpu.dma_semaphore, #tpu.memory_space<semaphore_mem>>
    %79 = tpu.memref_squeeze %78 : memref<1x1x!tpu.dma_semaphore, #tpu.memory_space<semaphore_mem>> -> memref<!tpu.dma_semaphore, #tpu.memory_space<semaphore_mem>>
    tpu.enqueue_dma source(%76 : memref<1x32xf32, #tpu.memory_space<any>>) target(%77 : memref<1x32xf32, #tpu.memory_space<vmem>>) target_semaphore(%79 : memref<!tpu.dma_semaphore, #tpu.memory_space<semaphore_mem>>)
    %c0_i32_80 = arith.constant 0 : i32
    %c0_i32_81 = arith.constant 0 : i32
    %c0_i32_82 = arith.constant 0 : i32
    %80 = tpu.memref_slice %arg3[%0, %c0_i32_82] : memref<16x32xf32, #tpu.memory_space<any>> -> memref<1x32xf32, #tpu.memory_space<any>>
    %c0_i32_83 = arith.constant 0 : i32
    %c0_i32_84 = arith.constant 0 : i32
    %81 = tpu.memref_slice %arg11[%c0_i32_83, %c0_i32_84] : memref<8x32xf32, #tpu.memory_space<vmem>> -> memref<1x32xf32, #tpu.memory_space<vmem>>
    %82 = tpu.memref_slice %arg13[%c0_i32_80, %c0_i32_81] : memref<2x8x!tpu.dma_semaphore, #tpu.memory_space<semaphore_mem>> -> memref<1x1x!tpu.dma_semaphore, #tpu.memory_space<semaphore_mem>>
    %83 = tpu.memref_squeeze %82 : memref<1x1x!tpu.dma_semaphore, #tpu.memory_space<semaphore_mem>> -> memref<!tpu.dma_semaphore, #tpu.memory_space<semaphore_mem>>
    tpu.wait_dma2 semaphore(%83 : memref<!tpu.dma_semaphore, #tpu.memory_space<semaphore_mem>>) src(%80 : memref<1x32xf32, #tpu.memory_space<any>>) dst(%81 : memref<1x32xf32, #tpu.memory_space<vmem>>)
    %c1_i32_85 = arith.constant 1 : i32
    %c0_i32_86 = arith.constant 0 : i32
    %c0_i32_87 = arith.constant 0 : i32
    %84 = tpu.memref_slice %arg4[%1, %c0_i32_87] : memref<8x32xf32, #tpu.memory_space<any>> -> memref<1x32xf32, #tpu.memory_space<any>>
    %c0_i32_88 = arith.constant 0 : i32
    %c0_i32_89 = arith.constant 0 : i32
    %85 = tpu.memref_slice %arg12[%c0_i32_88, %c0_i32_89] : memref<8x32xf32, #tpu.memory_space<vmem>> -> memref<1x32xf32, #tpu.memory_space<vmem>>
    %86 = tpu.memref_slice %arg13[%c1_i32_85, %c0_i32_86] : memref<2x8x!tpu.dma_semaphore, #tpu.memory_space<semaphore_mem>> -> memref<1x1x!tpu.dma_semaphore, #tpu.memory_space<semaphore_mem>>
    %87 = tpu.memref_squeeze %86 : memref<1x1x!tpu.dma_semaphore, #tpu.memory_space<semaphore_mem>> -> memref<!tpu.dma_semaphore, #tpu.memory_space<semaphore_mem>>
    tpu.wait_dma2 semaphore(%87 : memref<!tpu.dma_semaphore, #tpu.memory_space<semaphore_mem>>) src(%84 : memref<1x32xf32, #tpu.memory_space<any>>) dst(%85 : memref<1x32xf32, #tpu.memory_space<vmem>>)
    %c0_i32_90 = arith.constant 0 : i32
    %c1_i32_91 = arith.constant 1 : i32
    %c0_i32_92 = arith.constant 0 : i32
    %88 = tpu.memref_slice %arg3[%10, %c0_i32_92] : memref<16x32xf32, #tpu.memory_space<any>> -> memref<1x32xf32, #tpu.memory_space<any>>
    %c1_i32_93 = arith.constant 1 : i32
    %c0_i32_94 = arith.constant 0 : i32
    %89 = tpu.memref_slice %arg11[%c1_i32_93, %c0_i32_94] : memref<8x32xf32, #tpu.memory_space<vmem>> -> memref<1x32xf32, #tpu.memory_space<vmem>>
    %90 = tpu.memref_slice %arg13[%c0_i32_90, %c1_i32_91] : memref<2x8x!tpu.dma_semaphore, #tpu.memory_space<semaphore_mem>> -> memref<1x1x!tpu.dma_semaphore, #tpu.memory_space<semaphore_mem>>
    %91 = tpu.memref_squeeze %90 : memref<1x1x!tpu.dma_semaphore, #tpu.memory_space<semaphore_mem>> -> memref<!tpu.dma_semaphore, #tpu.memory_space<semaphore_mem>>
    tpu.wait_dma2 semaphore(%91 : memref<!tpu.dma_semaphore, #tpu.memory_space<semaphore_mem>>) src(%88 : memref<1x32xf32, #tpu.memory_space<any>>) dst(%89 : memref<1x32xf32, #tpu.memory_space<vmem>>)
    %c1_i32_95 = arith.constant 1 : i32
    %c1_i32_96 = arith.constant 1 : i32
    %c0_i32_97 = arith.constant 0 : i32
    %92 = tpu.memref_slice %arg4[%11, %c0_i32_97] : memref<8x32xf32, #tpu.memory_space<any>> -> memref<1x32xf32, #tpu.memory_space<any>>
    %c1_i32_98 = arith.constant 1 : i32
    %c0_i32_99 = arith.constant 0 : i32
    %93 = tpu.memref_slice %arg12[%c1_i32_98, %c0_i32_99] : memref<8x32xf32, #tpu.memory_space<vmem>> -> memref<1x32xf32, #tpu.memory_space<vmem>>
    %94 = tpu.memref_slice %arg13[%c1_i32_95, %c1_i32_96] : memref<2x8x!tpu.dma_semaphore, #tpu.memory_space<semaphore_mem>> -> memref<1x1x!tpu.dma_semaphore, #tpu.memory_space<semaphore_mem>>
    %95 = tpu.memref_squeeze %94 : memref<1x1x!tpu.dma_semaphore, #tpu.memory_space<semaphore_mem>> -> memref<!tpu.dma_semaphore, #tpu.memory_space<semaphore_mem>>
    tpu.wait_dma2 semaphore(%95 : memref<!tpu.dma_semaphore, #tpu.memory_space<semaphore_mem>>) src(%92 : memref<1x32xf32, #tpu.memory_space<any>>) dst(%93 : memref<1x32xf32, #tpu.memory_space<vmem>>)
    %c0_i32_100 = arith.constant 0 : i32
    %c2_i32_101 = arith.constant 2 : i32
    %c0_i32_102 = arith.constant 0 : i32
    %96 = tpu.memref_slice %arg3[%20, %c0_i32_102] : memref<16x32xf32, #tpu.memory_space<any>> -> memref<1x32xf32, #tpu.memory_space<any>>
    %c2_i32_103 = arith.constant 2 : i32
    %c0_i32_104 = arith.constant 0 : i32
    %97 = tpu.memref_slice %arg11[%c2_i32_103, %c0_i32_104] : memref<8x32xf32, #tpu.memory_space<vmem>> -> memref<1x32xf32, #tpu.memory_space<vmem>>
    %98 = tpu.memref_slice %arg13[%c0_i32_100, %c2_i32_101] : memref<2x8x!tpu.dma_semaphore, #tpu.memory_space<semaphore_mem>> -> memref<1x1x!tpu.dma_semaphore, #tpu.memory_space<semaphore_mem>>
    %99 = tpu.memref_squeeze %98 : memref<1x1x!tpu.dma_semaphore, #tpu.memory_space<semaphore_mem>> -> memref<!tpu.dma_semaphore, #tpu.memory_space<semaphore_mem>>
    tpu.wait_dma2 semaphore(%99 : memref<!tpu.dma_semaphore, #tpu.memory_space<semaphore_mem>>) src(%96 : memref<1x32xf32, #tpu.memory_space<any>>) dst(%97 : memref<1x32xf32, #tpu.memory_space<vmem>>)
    %c1_i32_105 = arith.constant 1 : i32
    %c2_i32_106 = arith.constant 2 : i32
    %c0_i32_107 = arith.constant 0 : i32
    %100 = tpu.memref_slice %arg4[%21, %c0_i32_107] : memref<8x32xf32, #tpu.memory_space<any>> -> memref<1x32xf32, #tpu.memory_space<any>>
    %c2_i32_108 = arith.constant 2 : i32
    %c0_i32_109 = arith.constant 0 : i32
    %101 = tpu.memref_slice %arg12[%c2_i32_108, %c0_i32_109] : memref<8x32xf32, #tpu.memory_space<vmem>> -> memref<1x32xf32, #tpu.memory_space<vmem>>
    %102 = tpu.memref_slice %arg13[%c1_i32_105, %c2_i32_106] : memref<2x8x!tpu.dma_semaphore, #tpu.memory_space<semaphore_mem>> -> memref<1x1x!tpu.dma_semaphore, #tpu.memory_space<semaphore_mem>>
    %103 = tpu.memref_squeeze %102 : memref<1x1x!tpu.dma_semaphore, #tpu.memory_space<semaphore_mem>> -> memref<!tpu.dma_semaphore, #tpu.memory_space<semaphore_mem>>
    tpu.wait_dma2 semaphore(%103 : memref<!tpu.dma_semaphore, #tpu.memory_space<semaphore_mem>>) src(%100 : memref<1x32xf32, #tpu.memory_space<any>>) dst(%101 : memref<1x32xf32, #tpu.memory_space<vmem>>)
    %c0_i32_110 = arith.constant 0 : i32
    %c3_i32_111 = arith.constant 3 : i32
    %c0_i32_112 = arith.constant 0 : i32
    %104 = tpu.memref_slice %arg3[%30, %c0_i32_112] : memref<16x32xf32, #tpu.memory_space<any>> -> memref<1x32xf32, #tpu.memory_space<any>>
    %c3_i32_113 = arith.constant 3 : i32
    %c0_i32_114 = arith.constant 0 : i32
    %105 = tpu.memref_slice %arg11[%c3_i32_113, %c0_i32_114] : memref<8x32xf32, #tpu.memory_space<vmem>> -> memref<1x32xf32, #tpu.memory_space<vmem>>
    %106 = tpu.memref_slice %arg13[%c0_i32_110, %c3_i32_111] : memref<2x8x!tpu.dma_semaphore, #tpu.memory_space<semaphore_mem>> -> memref<1x1x!tpu.dma_semaphore, #tpu.memory_space<semaphore_mem>>
    %107 = tpu.memref_squeeze %106 : memref<1x1x!tpu.dma_semaphore, #tpu.memory_space<semaphore_mem>> -> memref<!tpu.dma_semaphore, #tpu.memory_space<semaphore_mem>>
    tpu.wait_dma2 semaphore(%107 : memref<!tpu.dma_semaphore, #tpu.memory_space<semaphore_mem>>) src(%104 : memref<1x32xf32, #tpu.memory_space<any>>) dst(%105 : memref<1x32xf32, #tpu.memory_space<vmem>>)
    %c1_i32_115 = arith.constant 1 : i32
    %c3_i32_116 = arith.constant 3 : i32
    %c0_i32_117 = arith.constant 0 : i32
    %108 = tpu.memref_slice %arg4[%31, %c0_i32_117] : memref<8x32xf32, #tpu.memory_space<any>> -> memref<1x32xf32, #tpu.memory_space<any>>
    %c3_i32_118 = arith.constant 3 : i32
    %c0_i32_119 = arith.constant 0 : i32
    %109 = tpu.memref_slice %arg12[%c3_i32_118, %c0_i32_119] : memref<8x32xf32, #tpu.memory_space<vmem>> -> memref<1x32xf32, #tpu.memory_space<vmem>>
    %110 = tpu.memref_slice %arg13[%c1_i32_115, %c3_i32_116] : memref<2x8x!tpu.dma_semaphore, #tpu.memory_space<semaphore_mem>> -> memref<1x1x!tpu.dma_semaphore, #tpu.memory_space<semaphore_mem>>
    %111 = tpu.memref_squeeze %110 : memref<1x1x!tpu.dma_semaphore, #tpu.memory_space<semaphore_mem>> -> memref<!tpu.dma_semaphore, #tpu.memory_space<semaphore_mem>>
    tpu.wait_dma2 semaphore(%111 : memref<!tpu.dma_semaphore, #tpu.memory_space<semaphore_mem>>) src(%108 : memref<1x32xf32, #tpu.memory_space<any>>) dst(%109 : memref<1x32xf32, #tpu.memory_space<vmem>>)
    %c0_i32_120 = arith.constant 0 : i32
    %c4_i32_121 = arith.constant 4 : i32
    %c0_i32_122 = arith.constant 0 : i32
    %112 = tpu.memref_slice %arg3[%40, %c0_i32_122] : memref<16x32xf32, #tpu.memory_space<any>> -> memref<1x32xf32, #tpu.memory_space<any>>
    %c4_i32_123 = arith.constant 4 : i32
    %c0_i32_124 = arith.constant 0 : i32
    %113 = tpu.memref_slice %arg11[%c4_i32_123, %c0_i32_124] : memref<8x32xf32, #tpu.memory_space<vmem>> -> memref<1x32xf32, #tpu.memory_space<vmem>>
    %114 = tpu.memref_slice %arg13[%c0_i32_120, %c4_i32_121] : memref<2x8x!tpu.dma_semaphore, #tpu.memory_space<semaphore_mem>> -> memref<1x1x!tpu.dma_semaphore, #tpu.memory_space<semaphore_mem>>
    %115 = tpu.memref_squeeze %114 : memref<1x1x!tpu.dma_semaphore, #tpu.memory_space<semaphore_mem>> -> memref<!tpu.dma_semaphore, #tpu.memory_space<semaphore_mem>>
    tpu.wait_dma2 semaphore(%115 : memref<!tpu.dma_semaphore, #tpu.memory_space<semaphore_mem>>) src(%112 : memref<1x32xf32, #tpu.memory_space<any>>) dst(%113 : memref<1x32xf32, #tpu.memory_space<vmem>>)
    %c1_i32_125 = arith.constant 1 : i32
    %c4_i32_126 = arith.constant 4 : i32
    %c0_i32_127 = arith.constant 0 : i32
    %116 = tpu.memref_slice %arg4[%41, %c0_i32_127] : memref<8x32xf32, #tpu.memory_space<any>> -> memref<1x32xf32, #tpu.memory_space<any>>
    %c4_i32_128 = arith.constant 4 : i32
    %c0_i32_129 = arith.constant 0 : i32
    %117 = tpu.memref_slice %arg12[%c4_i32_128, %c0_i32_129] : memref<8x32xf32, #tpu.memory_space<vmem>> -> memref<1x32xf32, #tpu.memory_space<vmem>>
    %118 = tpu.memref_slice %arg13[%c1_i32_125, %c4_i32_126] : memref<2x8x!tpu.dma_semaphore, #tpu.memory_space<semaphore_mem>> -> memref<1x1x!tpu.dma_semaphore, #tpu.memory_space<semaphore_mem>>
    %119 = tpu.memref_squeeze %118 : memref<1x1x!tpu.dma_semaphore, #tpu.memory_space<semaphore_mem>> -> memref<!tpu.dma_semaphore, #tpu.memory_space<semaphore_mem>>
    tpu.wait_dma2 semaphore(%119 : memref<!tpu.dma_semaphore, #tpu.memory_space<semaphore_mem>>) src(%116 : memref<1x32xf32, #tpu.memory_space<any>>) dst(%117 : memref<1x32xf32, #tpu.memory_space<vmem>>)
    %c0_i32_130 = arith.constant 0 : i32
    %c5_i32_131 = arith.constant 5 : i32
    %c0_i32_132 = arith.constant 0 : i32
    %120 = tpu.memref_slice %arg3[%50, %c0_i32_132] : memref<16x32xf32, #tpu.memory_space<any>> -> memref<1x32xf32, #tpu.memory_space<any>>
    %c5_i32_133 = arith.constant 5 : i32
    %c0_i32_134 = arith.constant 0 : i32
    %121 = tpu.memref_slice %arg11[%c5_i32_133, %c0_i32_134] : memref<8x32xf32, #tpu.memory_space<vmem>> -> memref<1x32xf32, #tpu.memory_space<vmem>>
    %122 = tpu.memref_slice %arg13[%c0_i32_130, %c5_i32_131] : memref<2x8x!tpu.dma_semaphore, #tpu.memory_space<semaphore_mem>> -> memref<1x1x!tpu.dma_semaphore, #tpu.memory_space<semaphore_mem>>
    %123 = tpu.memref_squeeze %122 : memref<1x1x!tpu.dma_semaphore, #tpu.memory_space<semaphore_mem>> -> memref<!tpu.dma_semaphore, #tpu.memory_space<semaphore_mem>>
    tpu.wait_dma2 semaphore(%123 : memref<!tpu.dma_semaphore, #tpu.memory_space<semaphore_mem>>) src(%120 : memref<1x32xf32, #tpu.memory_space<any>>) dst(%121 : memref<1x32xf32, #tpu.memory_space<vmem>>)
    %c1_i32_135 = arith.constant 1 : i32
    %c5_i32_136 = arith.constant 5 : i32
    %c0_i32_137 = arith.constant 0 : i32
    %124 = tpu.memref_slice %arg4[%51, %c0_i32_137] : memref<8x32xf32, #tpu.memory_space<any>> -> memref<1x32xf32, #tpu.memory_space<any>>
    %c5_i32_138 = arith.constant 5 : i32
    %c0_i32_139 = arith.constant 0 : i32
    %125 = tpu.memref_slice %arg12[%c5_i32_138, %c0_i32_139] : memref<8x32xf32, #tpu.memory_space<vmem>> -> memref<1x32xf32, #tpu.memory_space<vmem>>
    %126 = tpu.memref_slice %arg13[%c1_i32_135, %c5_i32_136] : memref<2x8x!tpu.dma_semaphore, #tpu.memory_space<semaphore_mem>> -> memref<1x1x!tpu.dma_semaphore, #tpu.memory_space<semaphore_mem>>
    %127 = tpu.memref_squeeze %126 : memref<1x1x!tpu.dma_semaphore, #tpu.memory_space<semaphore_mem>> -> memref<!tpu.dma_semaphore, #tpu.memory_space<semaphore_mem>>
    tpu.wait_dma2 semaphore(%127 : memref<!tpu.dma_semaphore, #tpu.memory_space<semaphore_mem>>) src(%124 : memref<1x32xf32, #tpu.memory_space<any>>) dst(%125 : memref<1x32xf32, #tpu.memory_space<vmem>>)
    %c0_i32_140 = arith.constant 0 : i32
    %c6_i32_141 = arith.constant 6 : i32
    %c0_i32_142 = arith.constant 0 : i32
    %128 = tpu.memref_slice %arg3[%60, %c0_i32_142] : memref<16x32xf32, #tpu.memory_space<any>> -> memref<1x32xf32, #tpu.memory_space<any>>
    %c6_i32_143 = arith.constant 6 : i32
    %c0_i32_144 = arith.constant 0 : i32
    %129 = tpu.memref_slice %arg11[%c6_i32_143, %c0_i32_144] : memref<8x32xf32, #tpu.memory_space<vmem>> -> memref<1x32xf32, #tpu.memory_space<vmem>>
    %130 = tpu.memref_slice %arg13[%c0_i32_140, %c6_i32_141] : memref<2x8x!tpu.dma_semaphore, #tpu.memory_space<semaphore_mem>> -> memref<1x1x!tpu.dma_semaphore, #tpu.memory_space<semaphore_mem>>
    %131 = tpu.memref_squeeze %130 : memref<1x1x!tpu.dma_semaphore, #tpu.memory_space<semaphore_mem>> -> memref<!tpu.dma_semaphore, #tpu.memory_space<semaphore_mem>>
    tpu.wait_dma2 semaphore(%131 : memref<!tpu.dma_semaphore, #tpu.memory_space<semaphore_mem>>) src(%128 : memref<1x32xf32, #tpu.memory_space<any>>) dst(%129 : memref<1x32xf32, #tpu.memory_space<vmem>>)
    %c1_i32_145 = arith.constant 1 : i32
    %c6_i32_146 = arith.constant 6 : i32
    %c0_i32_147 = arith.constant 0 : i32
    %132 = tpu.memref_slice %arg4[%61, %c0_i32_147] : memref<8x32xf32, #tpu.memory_space<any>> -> memref<1x32xf32, #tpu.memory_space<any>>
    %c6_i32_148 = arith.constant 6 : i32
    %c0_i32_149 = arith.constant 0 : i32
    %133 = tpu.memref_slice %arg12[%c6_i32_148, %c0_i32_149] : memref<8x32xf32, #tpu.memory_space<vmem>> -> memref<1x32xf32, #tpu.memory_space<vmem>>
    %134 = tpu.memref_slice %arg13[%c1_i32_145, %c6_i32_146] : memref<2x8x!tpu.dma_semaphore, #tpu.memory_space<semaphore_mem>> -> memref<1x1x!tpu.dma_semaphore, #tpu.memory_space<semaphore_mem>>
    %135 = tpu.memref_squeeze %134 : memref<1x1x!tpu.dma_semaphore, #tpu.memory_space<semaphore_mem>> -> memref<!tpu.dma_semaphore, #tpu.memory_space<semaphore_mem>>
    tpu.wait_dma2 semaphore(%135 : memref<!tpu.dma_semaphore, #tpu.memory_space<semaphore_mem>>) src(%132 : memref<1x32xf32, #tpu.memory_space<any>>) dst(%133 : memref<1x32xf32, #tpu.memory_space<vmem>>)
    %c0_i32_150 = arith.constant 0 : i32
    %c7_i32_151 = arith.constant 7 : i32
    %c0_i32_152 = arith.constant 0 : i32
    %136 = tpu.memref_slice %arg3[%70, %c0_i32_152] : memref<16x32xf32, #tpu.memory_space<any>> -> memref<1x32xf32, #tpu.memory_space<any>>
    %c7_i32_153 = arith.constant 7 : i32
    %c0_i32_154 = arith.constant 0 : i32
    %137 = tpu.memref_slice %arg11[%c7_i32_153, %c0_i32_154] : memref<8x32xf32, #tpu.memory_space<vmem>> -> memref<1x32xf32, #tpu.memory_space<vmem>>
    %138 = tpu.memref_slice %arg13[%c0_i32_150, %c7_i32_151] : memref<2x8x!tpu.dma_semaphore, #tpu.memory_space<semaphore_mem>> -> memref<1x1x!tpu.dma_semaphore, #tpu.memory_space<semaphore_mem>>
    %139 = tpu.memref_squeeze %138 : memref<1x1x!tpu.dma_semaphore, #tpu.memory_space<semaphore_mem>> -> memref<!tpu.dma_semaphore, #tpu.memory_space<semaphore_mem>>
    tpu.wait_dma2 semaphore(%139 : memref<!tpu.dma_semaphore, #tpu.memory_space<semaphore_mem>>) src(%136 : memref<1x32xf32, #tpu.memory_space<any>>) dst(%137 : memref<1x32xf32, #tpu.memory_space<vmem>>)
    %c1_i32_155 = arith.constant 1 : i32
    %c7_i32_156 = arith.constant 7 : i32
    %c0_i32_157 = arith.constant 0 : i32
    %140 = tpu.memref_slice %arg4[%71, %c0_i32_157] : memref<8x32xf32, #tpu.memory_space<any>> -> memref<1x32xf32, #tpu.memory_space<any>>
    %c7_i32_158 = arith.constant 7 : i32
    %c0_i32_159 = arith.constant 0 : i32
    %141 = tpu.memref_slice %arg12[%c7_i32_158, %c0_i32_159] : memref<8x32xf32, #tpu.memory_space<vmem>> -> memref<1x32xf32, #tpu.memory_space<vmem>>
    %142 = tpu.memref_slice %arg13[%c1_i32_155, %c7_i32_156] : memref<2x8x!tpu.dma_semaphore, #tpu.memory_space<semaphore_mem>> -> memref<1x1x!tpu.dma_semaphore, #tpu.memory_space<semaphore_mem>>
    %143 = tpu.memref_squeeze %142 : memref<1x1x!tpu.dma_semaphore, #tpu.memory_space<semaphore_mem>> -> memref<!tpu.dma_semaphore, #tpu.memory_space<semaphore_mem>>
    tpu.wait_dma2 semaphore(%143 : memref<!tpu.dma_semaphore, #tpu.memory_space<semaphore_mem>>) src(%140 : memref<1x32xf32, #tpu.memory_space<any>>) dst(%141 : memref<1x32xf32, #tpu.memory_space<vmem>>)
    %c0_160 = arith.constant 0 : index
    %c0_161 = arith.constant 0 : index
    %144 = vector.load %arg11[%c0_160, %c0_161] : memref<8x32xf32, #tpu.memory_space<vmem>>, vector<8x32xf32>
    %c0_162 = arith.constant 0 : index
    %c0_163 = arith.constant 0 : index
    %145 = vector.load %arg12[%c0_162, %c0_163] : memref<8x32xf32, #tpu.memory_space<vmem>>, vector<8x32xf32>
    %146 = tpu.concatenate %144, %145 in 1 : vector<8x32xf32>, vector<8x32xf32> -> vector<8x64xf32>
    %c0_164 = arith.constant 0 : index
    %c0_165 = arith.constant 0 : index
    %147 = vector.load %arg5[%c0_164, %c0_165] : memref<64x144xf32, #tpu.memory_space<vmem>>, vector<64x144xf32>
    %cst = arith.constant dense<0.000000e+00> : vector<8x144xf32>
    %148 = tpu.matmul %146, %147, %cst {dimension_numbers = #tpu.dot_dimension_numbers<[1], [0], [0], [1], [0, 0, 1, 1], [], []>} : vector<8x64xf32>, vector<64x144xf32>, vector<8x144xf32> -> vector<8x144xf32>
    %c0_166 = arith.constant 0 : index
    %c0_167 = arith.constant 0 : index
    %149 = vector.load %arg6[%c0_166, %c0_167] : memref<1x144xf32, #tpu.memory_space<vmem>>, vector<1x144xf32>
    %150 = vector.broadcast %149 : vector<1x144xf32> to vector<8x144xf32>
    %151 = arith.addf %148, %150 : vector<8x144xf32>
    %cst_168 = arith.constant 0.000000e+00 : f32
    %152 = vector.broadcast %cst_168 : f32 to vector<8x144xf32>
    %153 = arith.maximumf %151, %152 : vector<8x144xf32>
    %154 = arith.truncf %153 : vector<8x144xf32> to vector<8x144xbf16>
    %c0_169 = arith.constant 0 : index
    %c0_170 = arith.constant 0 : index
    %155 = vector.load %arg7[%c0_169, %c0_170] : memref<32x144xbf16, #tpu.memory_space<vmem>>, vector<32x144xbf16>
    %cst_171 = arith.constant dense<0.000000e+00> : vector<8x32xf32>
    %156 = tpu.matmul %154, %155, %cst_171 {dimension_numbers = #tpu.dot_dimension_numbers<[1], [1], [0], [0], [0, 0, 1, 0], [], []>} : vector<8x144xbf16>, vector<32x144xbf16>, vector<8x32xf32> -> vector<8x32xf32>
    %c0_172 = arith.constant 0 : index
    %c0_173 = arith.constant 0 : index
    %157 = vector.load %arg8[%c0_172, %c0_173] : memref<1x32xf32, #tpu.memory_space<vmem>>, vector<1x32xf32>
    %158 = vector.broadcast %157 : vector<1x32xf32> to vector<8x32xf32>
    %159 = arith.addf %156, %158 : vector<8x32xf32>
    %cst_174 = arith.constant 0.000000e+00 : f32
    %160 = vector.broadcast %cst_174 : f32 to vector<8x32xf32>
    %161 = arith.maximumf %159, %160 : vector<8x32xf32>
    %162 = arith.truncf %161 : vector<8x32xf32> to vector<8x32xbf16>
    %c0_175 = arith.constant 0 : index
    %c0_176 = arith.constant 0 : index
    %163 = vector.load %arg9[%c0_175, %c0_176] : memref<128x32xbf16, #tpu.memory_space<vmem>>, vector<128x32xbf16>
    %cst_177 = arith.constant dense<0.000000e+00> : vector<8x128xf32>
    %164 = tpu.matmul %162, %163, %cst_177 {dimension_numbers = #tpu.dot_dimension_numbers<[1], [1], [0], [0], [0, 0, 1, 0], [], []>} : vector<8x32xbf16>, vector<128x32xbf16>, vector<8x128xf32> -> vector<8x128xf32>
    %cst_178 = arith.constant 0.000000e+00 : f32
    %165 = vector.broadcast %cst_178 : f32 to vector<8x128xf32>
    %166 = arith.subf %165, %164 : vector<8x128xf32>
    %167 = math.exp %166 : vector<8x128xf32>
    %cst_179 = arith.constant 1.000000e+00 : f32
    %168 = vector.broadcast %cst_179 : f32 to vector<8x128xf32>
    %169 = arith.addf %168, %167 : vector<8x128xf32>
    %170 = tpu.reciprocal %169 : vector<8x128xf32> -> vector<8x128xf32>
    %c0_180 = arith.constant 0 : index
    %c0_181 = arith.constant 0 : index
    %171 = vector.load %arg10[%c0_180, %c0_181] : memref<8x128xf32, #tpu.memory_space<vmem>>, vector<8x128xf32>
    tpu.vector_store %arg10[%c0_180, %c0_181], %170 {strides = array<i32>} : memref<8x128xf32, #tpu.memory_space<vmem>>, vector<8x128xf32>,
    return
  }
  func.func @transform_2(%arg0: i32, %arg1: memref<8xi32, #tpu.memory_space<smem>>, %arg2: memref<8xi32, #tpu.memory_space<smem>>) -> (i32, i32) {
    %c0_i32 = arith.constant 0 : i32
    %c0_i32_0 = arith.constant 0 : i32
    %c0_i32_1 = arith.constant 0 : i32
    return %c0_i32, %c0_i32_0 : i32, i32
  }
  func.func @transform_3(%arg0: i32, %arg1: memref<8xi32, #tpu.memory_space<smem>>, %arg2: memref<8xi32, #tpu.memory_space<smem>>) -> (i32, i32) {
    %c0_i32 = arith.constant 0 : i32
    %c0_i32_0 = arith.constant 0 : i32
    %c0_i32_1 = arith.constant 0 : i32
    return %c0_i32, %c0_i32_0 : i32, i32
  }
  func.func @transform_4(%arg0: i32, %arg1: memref<8xi32, #tpu.memory_space<smem>>, %arg2: memref<8xi32, #tpu.memory_space<smem>>) -> (i32, i32) {
    %c0_i32 = arith.constant 0 : i32
    %c0_i32_0 = arith.constant 0 : i32
    %c0_i32_1 = arith.constant 0 : i32
    return %c0_i32, %c0_i32_0 : i32, i32
  }
  func.func @transform_5(%arg0: i32, %arg1: memref<8xi32, #tpu.memory_space<smem>>, %arg2: memref<8xi32, #tpu.memory_space<smem>>) -> (i32, i32) {
    %c0_i32 = arith.constant 0 : i32
    %c0_i32_0 = arith.constant 0 : i32
    %c0_i32_1 = arith.constant 0 : i32
    return %c0_i32, %c0_i32_0 : i32, i32
  }
  func.func @transform_6(%arg0: i32, %arg1: memref<8xi32, #tpu.memory_space<smem>>, %arg2: memref<8xi32, #tpu.memory_space<smem>>) -> (i32, i32) {
    %c0_i32 = arith.constant 0 : i32
    %c0_i32_0 = arith.constant 0 : i32
    return %arg0, %c0_i32 : i32, i32
  }
  func.func @transform_7(%arg0: i32, %arg1: memref<8xi32, #tpu.memory_space<smem>>, %arg2: memref<8xi32, #tpu.memory_space<smem>>) -> (i32, i32) {
    %c0_i32 = arith.constant 0 : i32
    %c0_i32_0 = arith.constant 0 : i32
    return %c0_i32, %arg0 : i32, i32
  }
}

</mosaic_0001>

<bundles_post_ra>
// kernel: kge_forward.1
= control target key start
LH: loop header
LB: loop body
LE: loop exit
PB: predicated region body
PF: predicated region fallthrough
CT: control target
= control target key end

     0   :  { %s1288_s15 = smov [#allocation6]   ;;  %s1289_s16 = smov [#allocation7]   ;;  %s1513_s0 = inlined_call_operand.vmem [shape: s32[8], index: 0, kind: input, shape index: {}]   ;;  %s1514_s2 = inlined_call_operand.vmem [shape: f32[16,32], index: 2, kind: input, shape index: {}]   ;;  %s1515_s3 = inlined_call_operand.vmem [shape: f32[8,32], index: 3, kind: input, shape index: {}]   ;;  %s1516_s4 = inlined_call_operand.vmem [shape: f32[64,144], index: 4, kind: input, shape index: {}]   ;;  %s1517_s5 = inlined_call_operand.vmem [shape: f32[1,144], index: 5, kind: input, shape index: {}]   ;;  %s1518_s6 = inlined_call_operand.vmem [shape: bf16[32,144], index: 6, kind: input, shape index: {}]   ;;  %s1519_s7 = inlined_call_operand.vmem [shape: f32[1,32], index: 7, kind: input, shape index: {}]   ;;  %s1520_s8 = inlined_call_operand.vmem [shape: bf16[128,32], index: 8, kind: input, shape index: {}]   ;;  %s1521_s9 = inlined_call_operand.vmem [shape: f32[8,128], index: 9, kind: output, shape index: {}]   ;;  %s1522_s1 = inlined_call_operand.vmem [shape: s32[8], index: 1, kind: input, shape index: {}]  }
   0x1   :  { %s15_s11 = sshll.u32 %s1513_s0, 4  ;;  %s20_s14 = sshll.u32 %s1522_s1, 4  ;;  %s16_s11 = int_to_ptr.vmem [resolvable:$true] %s15_s11  ;;  %s21_s14 = int_to_ptr.vmem [resolvable:$true] %s20_s14 }
   0x2   :  { %18 = dma.vmem_to_smem %s16_s11, 16, %s1288_s15, [#allocation5] }
   0x3   :  { %23 = dma.vmem_to_smem %s21_s14, 16, %s1289_s16, [#allocation5] }
   0x4   :  { %1254 = dma.done.wait [#allocation5], 32 }
   0x5   :  { %1255 = vsyncadd [#allocation5], 4294967264 }
   0x6   :  { %26 = sfence }
   0x7   :  { %s38_s17 = sld [smem:[#allocation6]] }
   0x8   :  { %s39_s18 = sld [smem:[#allocation7]] }
   0xd   :  { %s40_s21 = scalar_lea.vmem %s1514_s2, %s38_s17 }
   0xe   :  { %v55_v0 = vld [vmem:[%s40_s21] sm:$0x1] }
   0xf   :  { %56 = vst [vmem:[#allocation2] sm:$0x1] %v55_v0 }
  0x10   :  { %74 = vsyncadd [#allocation4], 16  ;;  %s75_s22 = scalar_lea.vmem %s1515_s3, %s39_s18 }
  0x11   :  { %v91_v1 = vld [vmem:[%s75_s22] sm:$0x1] }
  0x12   :  { %92 = vst [vmem:[#allocation3] sm:$0x1] %v91_v1 }
  0x13   :  { %110 = vsyncadd [#allocation4 + $0x8], 16  ;;  %s1128_s23 = sld [smem:[#allocation6 + $0x1]] }
  0x14   :  { %s1129_s24 = sld [smem:[#allocation7 + $0x1]] }
  0x19   :  { %s113_s27 = scalar_lea.vmem %s1514_s2, %s1128_s23 }
  0x1a   :  { %v130_v2 = vld [vmem:[%s113_s27] sm:$0x1] }
  0x1b   :  { %131 = vst [vmem:[#allocation2 + $0x1] sm:$0x1] %v130_v2 }
  0x1c   :  { %149 = vsyncadd [#allocation4 + $0x1], 16  ;;  %s150_s30 = scalar_lea.vmem %s1515_s3, %s1129_s24 }
  0x1d   :  { %v167_v3 = vld [vmem:[%s150_s30] sm:$0x1] }
  0x1e   :  { %168 = vst [vmem:[#allocation3 + $0x1] sm:$0x1] %v167_v3 }
  0x1f   :  { %186 = vsyncadd [#allocation4 + $0x9], 16  ;;  %s1130_s10 = sld [smem:[#allocation6 + $0x2]] }
  0x20   :  { %s1131_s11 = sld [smem:[#allocation7 + $0x2]] }
  0x25   :  { %s189_s14 = scalar_lea.vmem %s1514_s2, %s1130_s10 }
  0x26   :  { %v206_v4 = vld [vmem:[%s189_s14] sm:$0x1] }
  0x27   :  { %207 = vst [vmem:[#allocation2 + $0x2] sm:$0x1] %v206_v4 }
  0x28   :  { %225 = vsyncadd [#allocation4 + $0x2], 16  ;;  %s226_s17 = scalar_lea.vmem %s1515_s3, %s1131_s11 }
  0x29   :  { %v243_v5 = vld [vmem:[%s226_s17] sm:$0x1] }
  0x2a   :  { %244 = vst [vmem:[#allocation3 + $0x2] sm:$0x1] %v243_v5 }
  0x2b   :  { %262 = vsyncadd [#allocation4 + $0xa], 16  ;;  %s1132_s18 = sld [smem:[#allocation6 + $0x3]] }
  0x2c   :  { %s1133_s19 = sld [smem:[#allocation7 + $0x3]] }
  0x31   :  { %s265_s0 = scalar_lea.vmem %s1514_s2, %s1132_s18 }
  0x32   :  { %v282_v6 = vld [vmem:[%s265_s0] sm:$0x1] }
  0x33   :  { %283 = vst [vmem:[#allocation2 + $0x3] sm:$0x1] %v282_v6 }
  0x34   :  { %301 = vsyncadd [#allocation4 + $0x3], 16  ;;  %s302_s23 = scalar_lea.vmem %s1515_s3, %s1133_s19 }
  0x35   :  { %v319_v7 = vld [vmem:[%s302_s23] sm:$0x1] }
  0x36   :  { %320 = vst [vmem:[#allocation3 + $0x3] sm:$0x1] %v319_v7 }
  0x37   :  { %338 = vsyncadd [#allocation4 + $0xb], 16  ;;  %s1134_s24 = sld [smem:[#allocation6 + $0x4]] }
  0x38   :  { %s1135_s25 = sld [smem:[#allocation7 + $0x4]] }
  0x3d   :  { %s341_s28 = scalar_lea.vmem %s1514_s2, %s1134_s24 }
  0x3e   :  { %v358_v8 = vld [vmem:[%s341_s28] sm:$0x1] }
  0x3f   :  { %359 = vst [vmem:[#allocation2 + $0x4] sm:$0x1] %v358_v8 }
  0x40   :  { %377 = vsyncadd [#allocation4 + $0x4], 16  ;;  %s378_s10 = scalar_lea.vmem %s1515_s3, %s1135_s25 }
  0x41   :  { %v395_v9 = vld [vmem:[%s378_s10] sm:$0x1] }
  0x42   :  { %396 = vst [vmem:[#allocation3 + $0x4] sm:$0x1] %v395_v9 }
  0x43   :  { %414 = vsyncadd [#allocation4 + $0xc], 16  ;;  %s1136_s11 = sld [smem:[#allocation6 + $0x5]] }
  0x44   :  { %s1137_s12 = sld [smem:[#allocation7 + $0x5]] }
  0x49   :  { %s417_s15 = scalar_lea.vmem %s1514_s2, %s1136_s11 }
  0x4a   :  { %v434_v10 = vld [vmem:[%s417_s15] sm:$0x1] }
  0x4b   :  { %435 = vst [vmem:[#allocation2 + $0x5] sm:$0x1] %v434_v10 }
  0x4c   :  { %453 = vsyncadd [#allocation4 + $0x5], 16  ;;  %s454_s18 = scalar_lea.vmem %s1515_s3, %s1137_s12 }
  0x4d   :  { %v471_v11 = vld [vmem:[%s454_s18] sm:$0x1] }
  0x4e   :  { %472 = vst [vmem:[#allocation3 + $0x5] sm:$0x1] %v471_v11 }
  0x4f   :  { %490 = vsyncadd [#allocation4 + $0xd], 16  ;;  %s1138_s19 = sld [smem:[#allocation6 + $0x6]] }
  0x50   :  { %s1139_s20 = sld [smem:[#allocation7 + $0x6]] }
  0x55   :  { %s493_s1 = scalar_lea.vmem %s1514_s2, %s1138_s19 }
  0x56   :  { %v510_v12 = vld [vmem:[%s493_s1] sm:$0x1] }
  0x57   :  { %511 = vst [vmem:[#allocation2 + $0x6] sm:$0x1] %v510_v12 }
  0x58   :  { %529 = vsyncadd [#allocation4 + $0x6], 16  ;;  %s530_s24 = scalar_lea.vmem %s1515_s3, %s1139_s20 }
  0x59   :  { %v547_v13 = vld [vmem:[%s530_s24] sm:$0x1] }
  0x5a   :  { %548 = vst [vmem:[#allocation3 + $0x6] sm:$0x1] %v547_v13 }
  0x5b   :  { %566 = vsyncadd [#allocation4 + $0xe], 16  ;;  %s1140_s25 = sld [smem:[#allocation6 + $0x7]] }
  0x5c   :  { %s1141_s26 = sld [smem:[#allocation7 + $0x7]] }
  0x61   :  { %s569_s29 = scalar_lea.vmem %s1514_s2, %s1140_s25 }
  0x62   :  { %v586_v14 = vld [vmem:[%s569_s29] sm:$0x1] }
  0x63   :  { %587 = vst [vmem:[#allocation2 + $0x7] sm:$0x1] %v586_v14 }
  0x64   :  { %605 = vsyncadd [#allocation4 + $0x7], 16  ;;  %s606_s11 = scalar_lea.vmem %s1515_s3, %s1141_s26 }
  0x65   :  { %v623_v15 = vld [vmem:[%s606_s11] sm:$0x1] }
  0x66   :  { %624 = vst [vmem:[#allocation3 + $0x7] sm:$0x1] %v623_v15 }
  0x67   :  { %642 = vsyncadd [#allocation4 + $0xf], 16 }
  0x68   :  { %1256 = dma.done.wait [#allocation4], 16 }
  0x69   :  { %1257 = vsyncadd [#allocation4], 4294967280 }
  0x6a   :  { %1258 = dma.done.wait [#allocation4 + $0x8], 16 }
  0x6b   :  { %1259 = vsyncadd [#allocation4 + $0x8], 4294967280 }
  0x6c   :  { %1260 = dma.done.wait [#allocation4 + $0x1], 16 }
  0x6d   :  { %1261 = vsyncadd [#allocation4 + $0x1], 4294967280 }
  0x6e   :  { %1262 = dma.done.wait [#allocation4 + $0x9], 16 }
  0x6f   :  { %1263 = vsyncadd [#allocation4 + $0x9], 4294967280 }
  0x70   :  { %1264 = dma.done.wait [#allocation4 + $0x2], 16 }
  0x71   :  { %1265 = vsyncadd [#allocation4 + $0x2], 4294967280 }
  0x72   :  { %1266 = dma.done.wait [#allocation4 + $0xa], 16 }
  0x73   :  { %1267 = vsyncadd [#allocation4 + $0xa], 4294967280 }
  0x74   :  { %1268 = dma.done.wait [#allocation4 + $0x3], 16 }
  0x75   :  { %1269 = vsyncadd [#allocation4 + $0x3], 4294967280 }
  0x76   :  { %1270 = dma.done.wait [#allocation4 + $0xb], 16 }
  0x77   :  { %1271 = vsyncadd [#allocation4 + $0xb], 4294967280 }
  0x78   :  { %1272 = dma.done.wait [#allocation4 + $0x4], 16 }
  0x79   :  { %1273 = vsyncadd [#allocation4 + $0x4], 4294967280 }
  0x7a   :  { %1274 = dma.done.wait [#allocation4 + $0xc], 16 }
  0x7b   :  { %1275 = vsyncadd [#allocation4 + $0xc], 4294967280 }
  0x7c   :  { %1276 = dma.done.wait [#allocation4 + $0x5], 16 }
  0x7d   :  { %1277 = vsyncadd [#allocation4 + $0x5], 4294967280 }
  0x7e   :  { %1278 = dma.done.wait [#allocation4 + $0xd], 16 }
  0x7f   :  { %1279 = vsyncadd [#allocation4 + $0xd], 4294967280 }
  0x80   :  { %1280 = dma.done.wait [#allocation4 + $0x6], 16 }
  0x81   :  { %1281 = vsyncadd [#allocation4 + $0x6], 4294967280 }
  0x82   :  { %1282 = dma.done.wait [#allocation4 + $0xe], 16 }
  0x83   :  { %1283 = vsyncadd [#allocation4 + $0xe], 4294967280 }
  0x84   :  { %1284 = dma.done.wait [#allocation4 + $0x7], 16 }
  0x85   :  { %1285 = vsyncadd [#allocation4 + $0x7], 4294967280 }
  0x86   :  { %1286 = dma.done.wait [#allocation4 + $0xf], 16 }
  0x87   :  { %1287 = vsyncadd [#allocation4 + $0xf], 4294967280  ;;  %v677_v16 = vld [vmem:[#allocation3] sm:$0xff]  ;;  %v698_v17 = vld [vmem:[%s1516_s4 + $0x70] sm:$0xff]  ;;  %s1290_s14 = smov 32   ;;  %vm682_vm0 = vcmask 261120  }
  0x88   :  { %v696_v18 = vld [vmem:[%s1516_s4 + $0x60] sm:$0xff]  ;;  %679 = vrot.lane.b32.xlu0 %v677_v16, %s1290_s14  ;;  %718 = vmatpush.msra.mxu1 %v698_v17  ;;  %v694_v19 = vld [vmem:[%s1516_s4 + $0x50] sm:$0xff]  ;;  %v699_v25 = vld [vmem:[%s1516_s4 + $0x78] sm:$0xff]  ;;  %vm706_vm1 = vcmask 523264   ;;  %vm780_vm2 = vcmask 130048  }
  0x89   :  { %v692_v20 = vld [vmem:[%s1516_s4 + $0x40] sm:$0xff]  ;;  %v690_v21 = vld [vmem:[%s1516_s4 + $0x30] sm:$0xff]  ;;  %v697_v26 = vld [vmem:[%s1516_s4 + $0x68] sm:$0xff] }
  0x8a   :  { %719 = vmatpush.msra.mxu1 %v696_v18  ;;  %v688_v22 = vld [vmem:[%s1516_s4 + $0x20] sm:$0xff]  ;;  %v686_v23 = vld [vmem:[%s1516_s4 + $0x10] sm:$0xff]  ;;  %v695_v27 = vld [vmem:[%s1516_s4 + $0x58] sm:$0xff] }
  0x8b   :  { %v684_v24 = vld [vmem:[%s1516_s4] sm:$0xff]  ;;  %v693_v28 = vld [vmem:[%s1516_s4 + $0x48] sm:$0xff]  ;;  %v691_v29 = vld [vmem:[%s1516_s4 + $0x38] sm:$0xff] }
  0x8c   :  { %720 = vmatpush.msra.mxu1 %v694_v19  ;;  %v689_v30 = vld [vmem:[%s1516_s4 + $0x28] sm:$0xff]  ;;  %v687_v31 = vld [vmem:[%s1516_s4 + $0x18] sm:$0xff]  ;;  %v1154_v33 = vld [vmem:[%s1518_s6 + $0x10] sm:$0xf] }
  0x8d   :  { %v685_v32 = vld [vmem:[%s1516_s4 + $0x8] sm:$0xff]  ;;  %v1213_v34 = vld [vmem:[%s1518_s6 + $0x14] sm:$0xf0]  ;;  %v676_v36 = vld [vmem:[#allocation2] sm:$0xff] }
  0x8e   :  { %721 = vmatpush.msra.mxu1 %v692_v20  ;;  %v1155_v35 = vor.u32 %v1213_v34, %v1154_v33  ;;  %v1212_v39 = vld [vmem:[%s1518_s6 + $0x14] sm:$0xf]  ;;  %v1156_v40 = vld [vmem:[%s1518_s6 + $0x18] sm:$0xf0]  ;;  %v1146_v41 = vld [vmem:[%s1518_s6] sm:$0xf] }
  0x8f   :  { %v1211_v42 = vld [vmem:[%s1518_s6 + $0x4] sm:$0xf0]  ;;  %v1159_v43 = vor.u32 %v1212_v39, %v1156_v40  ;;  %v1210_v46 = vld [vmem:[%s1518_s6 + $0x4] sm:$0xf]  ;;  %v1148_v47 = vld [vmem:[%s1518_s6 + $0x8] sm:$0xf0] }
  0x90   :  { %722 = vmatpush.msra.mxu1 %v690_v21  ;;  %796 = vmatpush.bf16.xpose.msra.mxu2 %v1155_v35  ;;  %v1147_v44 = vor.u32 %v1211_v42, %v1146_v41  ;;  %v1151_v48 = vor.u32 %v1210_v46, %v1148_v47  ;;  %v1221_v50 = vld [vmem:[%s1520_s8 + $0x38] sm:$0xff]  ;;  %v1220_v52 = vld [vmem:[%s1520_s8 + $0x30] sm:$0xff]  ;;  %v700_v54 = vld [vmem:[%s1517_s5] sm:$0x3] }
  0x91   :  { %v788_v45 = vsel %vm780_vm2, %v1159_v43, 0  ;;  %v899_v51 = vsel %vm682_vm0, %v1221_v50, 0  ;;  %v896_v53 = vsel %vm682_vm0, %v1220_v52, 0  ;;  %v1219_v55 = vld [vmem:[%s1520_s8 + $0x28] sm:$0xff]  ;;  %v702_v56 = vperm.slane %v700_v54, 0  ;;  %v1218_v61 = vld [vmem:[%s1520_s8 + $0x20] sm:$0xff] }
  0x92   :  { %723 = vmatpush.msra.mxu1 %v688_v22  ;;  %809 = vmatpush.bf16.xpose.msra.mxu3 %v788_v45  ;;  %v785_v49 = vsel %vm780_vm2, %v1151_v48, 0  ;;  %v893_v57 = vsel %vm682_vm0, %v1219_v55, 0  ;;  %v703_v63 = vperm.slane %v700_v54, 1  ;;  %v890_v0 = vsel %vm682_vm0, %v1218_v61, 0  ;;  %v1217_v4 = vld [vmem:[%s1520_s8 + $0x18] sm:$0xff]  ;;  %v1216_v7 = vld [vmem:[%s1520_s8 + $0x10] sm:$0xff] }
  0x93   :  { %901 = vmatpush.bf16.xpose.msra.mxu0 %v899_v51  ;;  %v887_v6 = vsel %vm682_vm0, %v1217_v4, 0  ;;  %v884_v8 = vsel %vm682_vm0, %v1216_v7, 0  ;;  %v1215_v9 = vld [vmem:[%s1520_s8 + $0x8] sm:$0xff]  ;;  %v1214_v11 = vld [vmem:[%s1520_s8] sm:$0xff] }
  0x94   :  { %724 = vmatpush.msra.mxu1 %v686_v23  ;;  %v881_v10 = vsel %vm682_vm0, %v1215_v9, 0  ;;  %v878_v12 = vsel %vm682_vm0, %v1214_v11, 0  ;;  %v1225_v14 = vld [vmem:[%s1519_s7] ss:$0 sm:$0xff] }
  0x96   :  { %725 = vmatpush.msra.mxu1 %v684_v24 }
  0x98   :  { %738 = vmatpush.msrb.mxu1 %v699_v25  ;;  %797 = vmatpush.bf16.xpose.msra.mxu2 %v1147_v44 }
  0x9a   :  { %739 = vmatpush.msrb.mxu1 %v697_v26  ;;  %810 = vmatpush.bf16.xpose.msra.mxu3 %v785_v49 }
  0x9b   :  { %902 = vmatpush.bf16.xpose.msra.mxu0 %v896_v53 }
  0x9c   :  { %740 = vmatpush.msrb.mxu1 %v695_v27 }
  0x9e   :  { %741 = vmatpush.msrb.mxu1 %v693_v28 }
  0xa0   :  { %742 = vmatpush.msrb.mxu1 %v691_v29 }
  0xa2   :  { %743 = vmatpush.msrb.mxu1 %v689_v30 }
  0xa3   :  { %903 = vmatpush.bf16.xpose.msra.mxu0 %v893_v57 }
  0xa4   :  { %744 = vmatpush.msrb.mxu1 %v687_v31 }
  0xa6   :  { %745 = vmatpush.msrb.mxu1 %v685_v32 }
  0xab   :  { %904 = vmatpush.bf16.xpose.msra.mxu0 %v890_v0 }
  0xb3   :  { %905 = vmatpush.bf16.xpose.msra.mxu0 %v887_v6 }
  0xbb   :  { %906 = vmatpush.bf16.xpose.msra.mxu0 %v884_v8 }
  0xc3   :  { %907 = vmatpush.bf16.xpose.msra.mxu0 %v881_v10 }
  0xcb   :  { %908 = vmatpush.bf16.xpose.msra.mxu0 %v878_v12 }
  0xfa   :  { %v680_v37 = vpop.permute.xlu0 %679 }
  0xfb   :  { %v683_v38 = vsel %vm682_vm0, %v676_v36, %v680_v37 }
  0xfc   :  { %1142 = vmatmul.msk.f32.vlgmr.msra.gmra.mxu1 %vm706_vm1, %v683_v38 }
 0x104   :  { %1143 = vmatmul.msk.f32.vlgmr.msrb.gmra.mxu1 %vm706_vm1, %v683_v38 }
 0x179   :  { %v727_v58 = vpop.f32.mrf.mxu1 }
 0x17a   :  { %v728_v59 = vadd.f32 %v727_v58, %v702_v56 }
 0x17c   :  { %v750_v60 = vmax.f32 %v728_v59, 0.0 }
 0x17e   :  { %v752_v62 = vpack.c.bf16 %v750_v60, %v750_v60 }
 0x180   :  { %798 = vmatmul.bf16.vlgmr.msra.gmra.mxu2 %v752_v62 }
 0x181   :  { %v747_v1 = vpop.f32.mrf.mxu1 }
 0x182   :  { %v748_v2 = vadd.f32 %v747_v1, %v703_v63 }
 0x184   :  { %v751_v3 = vmax.f32 %v748_v2, 0.0 }
 0x186   :  { %v753_v5 = vpack.c.bf16 %v751_v3, %v751_v3 }
 0x188   :  { %1160 = vmatmul.msk.bf16.vlgmr.msra.gmra.mxu3 %vm780_vm2, %v753_v5 }
 0x203   :  { %v799_v13 = vpop.f32.mrf.mxu2 }
 0x204   :  { %v800_v15 = vadd.f32 %v1225_v14, %v799_v13 }
 0x20b   :  { %v801_v16 = vpop.f32.mrf.mxu2  ;;  %v812_v17 = vpop.f32.mrf.mxu3 }
 0x20c   :  { %v813_v18 = vadd.f32 %v812_v17, %v800_v15 }
 0x20e   :  { %v816_v19 = vmax.f32 %v813_v18, 0.0 }
 0x210   :  { %v817_v20 = vpack.c.bf16 %v816_v19, %v816_v19 }
 0x212   :  { %1193 = vmatmul.msk.bf16.vlgmr.msra.gmra.mxu0 %vm682_vm0, %v817_v20 }
 0x213   :  { %v814_v21 = vpop.f32.mrf.mxu3 }
 0x28f   :  { %v910_v22 = vpop.f32.mrf.mxu0 }
 0x290   :  { %v914_v23 = vsub.f32 0.0, %v910_v22 }
 0x292   :  { %v915_v24 = vmul.f32 1.442695, %v914_v23 }
 0x294   :  { %1226 = vpow2.f32 %v915_v24 }
 0x297   :  { %v912_v25 = vpop.f32.mrf.mxu0 }
 0x29a   :  { %v1227_v26 = vpop.eup %1226 }
 0x29b   :  { %v917_v27 = vadd.f32 1.0, %v1227_v26 }
 0x29d   :  { %1228 = vrcp.f32 %v917_v27  ;;  %v929_v31 = vand.u32 2147483648, %v917_v27  ;;  %v927_v33 = vand.u32 2147483647, %v917_v27  ;;  %vm923_vm4 = vweird.f32 %v917_v27 }
 0x29f   :  { %v930_v35 = vor.u32 1.1754944e-38, %v929_v31  ;;  %vm928_vm6 = vcmp.eq.f32.partialorder %v927_v33, 8.507059e+37 }
 0x2a3   :  { %v1229_v28 = vpop.eup %1228 }
 0x2a4   :  { %v919_v29 = vmul.f32 %v1229_v28, %v917_v27  ;;  %vm924_vm3 = vweird.f32 %v1229_v28 }
 0x2a5   :  { %vm925_vm5 = vmor %vm923_vm4, %vm924_vm3 }
 0x2a6   :  { %v920_v30 = vsub.f32 1.0, %v919_v29 }
 0x2a8   :  { %v921_v32 = vmul.f32 %v1229_v28, %v920_v30 }
 0x2aa   :  { %v922_v34 = vadd.f32 %v1229_v28, %v921_v32 }
 0x2ac   :  { %v926_v36 = vsel %vm925_vm5, %v1229_v28, %v922_v34 }
 0x2ad   :  { %v931_v37 = vsel %vm928_vm6, %v930_v35, %v926_v36 }
 0x2ae   :  { %932 = vst [vmem:[%s1521_s9] sm:$0xff] %v931_v37 }
 0x2af   :  { %937 = vsyncmov [#allocation4] }
 0x2b2   :  { %s938_s23 = vpop.sfrf %937 }
 0x2b3   :  { %p1194_p0 = scmp.ne.s32.totalorder %s938_s23, 0 }
 0x2b5   :  { %942 = shalt.err (%p1194_p0)  }
 0x2b6   :  { %944 = vsyncmov [#allocation4 + $0x1] }
 0x2b9   :  { %s945_s24 = vpop.sfrf %944 }
 0x2ba   :  { %p1195_p1 = scmp.ne.s32.totalorder %s945_s24, 0 }
 0x2bc   :  { %949 = shalt.err (%p1195_p1)  }
 0x2bd   :  { %951 = vsyncmov [#allocation4 + $0x2] }
 0x2c0   :  { %s952_s25 = vpop.sfrf %951 }
 0x2c1   :  { %p1196_p2 = scmp.ne.s32.totalorder %s952_s25, 0 }
 0x2c3   :  { %956 = shalt.err (%p1196_p2)  }
 0x2c4   :  { %958 = vsyncmov [#allocation4 + $0x3] }
 0x2c7   :  { %s959_s26 = vpop.sfrf %958 }
 0x2c8   :  { %p1197_p3 = scmp.ne.s32.totalorder %s959_s26, 0 }
 0x2ca   :  { %963 = shalt.err (%p1197_p3)  }
 0x2cb   :  { %965 = vsyncmov [#allocation4 + $0x4] }
 0x2ce   :  { %s966_s27 = vpop.sfrf %965 }
 0x2cf   :  { %p1198_p4 = scmp.ne.s32.totalorder %s966_s27, 0 }
 0x2d1   :  { %970 = shalt.err (%p1198_p4)  }
 0x2d2   :  { %972 = vsyncmov [#allocation4 + $0x5] }
 0x2d5   :  { %s973_s9 = vpop.sfrf %972 }
 0x2d6   :  { %p1199_p5 = scmp.ne.s32.totalorder %s973_s9, 0 }
 0x2d8   :  { %977 = shalt.err (%p1199_p5)  }
 0x2d9   :  { %979 = vsyncmov [#allocation4 + $0x6] }
 0x2dc   :  { %s980_s28 = vpop.sfrf %979 }
 0x2dd   :  { %p1200_p6 = scmp.ne.s32.totalorder %s980_s28, 0 }
 0x2df   :  { %984 = shalt.err (%p1200_p6)  }
 0x2e0   :  { %986 = vsyncmov [#allocation4 + $0x7] }
 0x2e3   :  { %s987_s29 = vpop.sfrf %986 }
 0x2e4   :  { %p1201_p7 = scmp.ne.s32.totalorder %s987_s29, 0 }
 0x2e6   :  { %991 = shalt.err (%p1201_p7)  }
 0x2e7   :  { %993 = vsyncmov [#allocation4 + $0x8] }
 0x2ea   :  { %s994_s30 = vpop.sfrf %993 }
 0x2eb   :  { %p1202_p8 = scmp.ne.s32.totalorder %s994_s30, 0 }
 0x2ed   :  { %998 = shalt.err (%p1202_p8)  }
 0x2ee   :  { %1000 = vsyncmov [#allocation4 + $0x9] }
 0x2f1   :  { %s1001_s10 = vpop.sfrf %1000 }
 0x2f2   :  { %p1203_p9 = scmp.ne.s32.totalorder %s1001_s10, 0 }
 0x2f4   :  { %1005 = shalt.err (%p1203_p9)  }
 0x2f5   :  { %1007 = vsyncmov [#allocation4 + $0xa] }
 0x2f8   :  { %s1008_s11 = vpop.sfrf %1007 }
 0x2f9   :  { %p1204_p10 = scmp.ne.s32.totalorder %s1008_s11, 0 }
 0x2fb   :  { %1012 = shalt.err (%p1204_p10)  }
 0x2fc   :  { %1014 = vsyncmov [#allocation4 + $0xb] }
 0x2ff   :  { %s1015_s2 = vpop.sfrf %1014 }
 0x300   :  { %p1205_p11 = scmp.ne.s32.totalorder %s1015_s2, 0 }
 0x302   :  { %1019 = shalt.err (%p1205_p11)  }
 0x303   :  { %1021 = vsyncmov [#allocation4 + $0xc] }
 0x306   :  { %s1022_s3 = vpop.sfrf %1021 }
 0x307   :  { %p1206_p12 = scmp.ne.s32.totalorder %s1022_s3, 0 }
 0x309   :  { %1026 = shalt.err (%p1206_p12)  }
 0x30a   :  { %1028 = vsyncmov [#allocation4 + $0xd] }
 0x30d   :  { %s1029_s12 = vpop.sfrf %1028 }
 0x30e   :  { %p1207_p13 = scmp.ne.s32.totalorder %s1029_s12, 0 }
 0x310   :  { %1033 = shalt.err (%p1207_p13)  }
 0x311   :  { %1035 = vsyncmov [#allocation4 + $0xe] }
 0x314   :  { %s1036_s13 = vpop.sfrf %1035 }
 0x315   :  { %p1208_p0 = scmp.ne.s32.totalorder %s1036_s13, 0 }
 0x317   :  { %1040 = shalt.err (%p1208_p0)  }
 0x318   :  { %1042 = vsyncmov [#allocation4 + $0xf] }
 0x31b   :  { %s1043_s6 = vpop.sfrf %1042 }
 0x31c   :  { %p1209_p1 = scmp.ne.s32.totalorder %s1043_s6, 0 }
 0x31e   :  { %1047 = shalt.err (%p1209_p1)  }

</bundles_post_ra>
